<compile_context>
chip_gen: v7x
topology: tpu7x:2x2x1
jax: 0.10.0
libtpu: 0.0.40
codegen_flags: <defaults>
</compile_context>

<pallas_src>
import jax
import jax.numpy as jnp
import numpy as np
from jax import lax
from jax.experimental import pallas as pl
from jax.experimental.pallas import tpu as pltpu


TILE_N = 512      # batch tile per grid step (sweepable; per-step VMEM ~5 MiB)


def _round_up(v, m):
    return ((v + m - 1) // m) * m


def cnn_kernel(x_ref, w1_ref, b1_ref, w2_ref, b2_ref,
               wf1_ref, bf1_ref, wf2_ref, bf2_ref, out_ref):
    x = x_ref[...]                                                  # (TN, 64) bf16

    # ---- conv1 (1->16 ch, 3x3 VALID) as one dense matmul + ReLU ----
    z1 = jnp.dot(x, w1_ref[...], preferred_element_type=jnp.float32) + b1_ref[...]
    x1 = jnp.maximum(z1, 0.0).astype(jnp.bfloat16)                  # (TN, 576)

    # ---- conv2 (16->32 ch, 3x3 VALID) as one dense matmul + ReLU ----
    z2 = jnp.dot(x1, w2_ref[...], preferred_element_type=jnp.float32) + b2_ref[...]
    x2 = jnp.maximum(z2, 0.0)                                       # (TN, 512) f32

    # ---- maxpool 2x2 stride 2: columns are ordered (pos[4], window[4], ch[32]),
    #      so pooling = elementwise max of four contiguous 128-lane slabs. ----
    pooled = jnp.maximum(jnp.maximum(x2[:, 0:128],   x2[:, 128:256]),
                         jnp.maximum(x2[:, 256:384], x2[:, 384:512]))   # (TN, 128)
    pooled = pooled.astype(jnp.bfloat16)

    # ---- fc1 + ReLU (output padded to 128 lanes; padded cols are exactly 0) ----
    h1 = jnp.maximum(
        jnp.dot(pooled, wf1_ref[...], preferred_element_type=jnp.float32)
        + bf1_ref[...], 0.0).astype(jnp.bfloat16)                   # (TN, 128)

    # ---- fc2, transposed output: (2, 128) x (TN, 128)^T -> (2, TN) ----
    logits_t = lax.dot_general(
        wf2_ref[...], h1, (((1,), (1,)), ((), ())),
        preferred_element_type=jnp.float32)                         # (2, TN)
    out_ref[...] = logits_t + bf2_ref[...]                          # bias (2, 1) bcast


def init_params(key):
    """Deterministic synthetic parameters, PyTorch layouts (OIHW conv, (out,in) linear)."""
    ks = jax.random.split(key, 8)
    return {
        "w1":  jax.random.normal(ks[0], (16, 1, 3, 3),  jnp.float32) * 0.20,
        "b1":  jax.random.normal(ks[1], (16,),          jnp.float32) * 0.10,
        "w2":  jax.random.normal(ks[2], (32, 16, 3, 3), jnp.float32) * 0.08,
        "b2":  jax.random.normal(ks[3], (32,),          jnp.float32) * 0.05,
        "wf1": jax.random.normal(ks[4], (64, 128),      jnp.float32) * 0.08,
        "bf1": jax.random.normal(ks[5], (64,),          jnp.float32) * 0.05,
        "wf2": jax.random.normal(ks[6], (2, 64),        jnp.float32) * 0.10,
        "bf2": jax.random.normal(ks[7], (2,),           jnp.float32) * 0.05,
    }


def prepare_params(params):
    """One-time relayout of PyTorch-style params into dense, kernel-friendly matrices."""
    w1 = np.asarray(params["w1"])                                   # (16, 1, 3, 3)
    w2 = np.asarray(params["w2"])                                   # (32, 16, 3, 3)

    # conv1 dense: input pixel (h*8+w) -> conv1 output ((oy*6+ox)*16 + oc)
    w1d = np.zeros((64, 6 * 6 * 16), np.float32)
    for oy in range(6):
        for ox in range(6):
            col0 = (oy * 6 + ox) * 16
            for dy in range(3):
                for dx in range(3):
                    row = (oy + dy) * 8 + (ox + dx)
                    w1d[row, col0:col0 + 16] = w1[:, 0, dy, dx]
    b1d = np.tile(np.asarray(params["b1"]), 36).reshape(1, 576)

    # conv2 dense: conv1 feature ((iy*6+ix)*16 + cin) ->
    #   conv2 output column p*128 + window*32 + oc, where for output pos (oy, ox):
    #   p = (oy%2)*2 + (ox%2)   (position within 2x2 pool window)
    #   window = (oy//2)*2 + (ox//2)   (pooled spatial position, HW order)
    w2d = np.zeros((576, 512), np.float32)
    for oy in range(4):
        for ox in range(4):
            p = (oy % 2) * 2 + (ox % 2)
            win = (oy // 2) * 2 + (ox // 2)
            col0 = p * 128 + win * 32
            for dy in range(3):
                for dx in range(3):
                    row0 = ((oy + dy) * 6 + (ox + dx)) * 16
                    w2d[row0:row0 + 16, col0:col0 + 32] = w2[:, :, dy, dx].T
    b2d = np.tile(np.asarray(params["b2"]), 16).reshape(1, 512)

    # fc1: pooled column j = window*32 + c (HWC); PyTorch flatten is CHW: i = c*4 + window.
    wf1_t = np.asarray(params["wf1"]).T                             # (128, 64), CHW rows
    perm = np.array([(j % 32) * 4 + (j // 32) for j in range(128)])
    wf1 = np.zeros((128, 128), np.float32)
    wf1[:, :64] = wf1_t[perm]                                       # pad to 128 out lanes
    bf1 = np.zeros((1, 128), np.float32)
    bf1[0, :64] = np.asarray(params["bf1"])

    # fc2: (2, 64) -> (2, 128) K-padded (padded h1 cols are zero), transposed output form.
    wf2t = np.zeros((2, 128), np.float32)
    wf2t[:, :64] = np.asarray(params["wf2"])
    bf2t = np.asarray(params["bf2"]).reshape(2, 1).astype(np.float32)

    return {
        "w1d": jnp.asarray(w1d, jnp.bfloat16),  "b1d": jnp.asarray(b1d, jnp.float32),
        "w2d": jnp.asarray(w2d, jnp.bfloat16),  "b2d": jnp.asarray(b2d, jnp.float32),
        "wf1": jnp.asarray(wf1, jnp.bfloat16),  "bf1": jnp.asarray(bf1, jnp.float32),
        "wf2t": jnp.asarray(wf2t, jnp.bfloat16), "bf2t": jnp.asarray(bf2t, jnp.float32),
    }


def cnn_forward(x_nchw, kp, tile_n=TILE_N):
    n = x_nchw.shape[0]
    x = x_nchw.reshape(n, 64).astype(jnp.bfloat16)                  # (N, 64), Cin == 1

    tile_n = min(tile_n, _round_up(max(n, 1), 128))                 # keep small batches cheap
    n_blocks = pl.cdiv(n, tile_n)
    n_pad = n_blocks * tile_n
    if n_pad != n:                                                   # tail tile: zero-pad
        x = jnp.pad(x, ((0, n_pad - n), (0, 0)))

    def full(shape):                                                 # whole-array block
        return pl.BlockSpec(shape, lambda i, _s=shape: (0,) * len(_s))

    out = pl.pallas_call(
        cnn_kernel,
        out_shape=jax.ShapeDtypeStruct((2, n_pad), jnp.float32),
        grid=(n_blocks,),
        in_specs=[
            pl.BlockSpec((tile_n, 64), lambda i: (i, 0)),            # x tile
            full((64, 576)),  full((1, 576)),                        # conv1 dense
            full((576, 512)), full((1, 512)),                        # conv2 dense
            full((128, 128)), full((1, 128)),                        # fc1 (padded)
            full((2, 128)),   full((2, 1)),                          # fc2 (transposed)
        ],
        out_specs=pl.BlockSpec((2, tile_n), lambda i: (0, i)),       # lane-dense logits^T
        compiler_params=pltpu.CompilerParams(
            dimension_semantics=("parallel",),      # megacore batch sharding on v7x
            vmem_limit_bytes=32 * 1024 * 1024,      # safe on v7x (64 MiB) and v5e/v6e
        ),
    )(x, kp["w1d"], kp["b1d"], kp["w2d"], kp["b2d"],
      kp["wf1"], kp["bf1"], kp["wf2t"], kp["bf2t"])

    return out[:, :n].T                                              # (N, 2)


def cnn_reference(x_nchw, params):
    """Pure-JAX f32 mirror of the PyTorch forward (NCHW, CHW flatten)."""
    dn = ("NCHW", "OIHW", "NCHW")
    x = lax.conv_general_dilated(x_nchw, params["w1"], (1, 1), "VALID",
                                 dimension_numbers=dn)
    x = jnp.maximum(x + params["b1"][None, :, None, None], 0.0)
    x = lax.conv_general_dilated(x, params["w2"], (1, 1), "VALID",
                                 dimension_numbers=dn)
    x = jnp.maximum(x + params["b2"][None, :, None, None], 0.0)
    x = lax.reduce_window(x, -jnp.inf, lax.max, (1, 1, 2, 2), (1, 1, 2, 2), "VALID")
    x = x.reshape(x.shape[0], -1)                                   # CHW flatten
    x = jnp.maximum(x @ params["wf1"].T + params["bf1"], 0.0)
    return x @ params["wf2"].T + params["bf2"]


if __name__ == "__main__":
    key = jax.random.PRNGKey(0)
    kp_key, kx_key = jax.random.split(key)
    params = init_params(kp_key)
    kparams = prepare_params(params)     # one-time weight relayout (dense, bf16)

    # fc1 expects 32*2*2 features -> input spatial is 8x8 with 1 channel.
    x = jax.random.normal(kx_key, (2, 1, 8, 8), jnp.float32)

    out = jax.block_until_ready(cnn_forward(x, kparams))
    ref = jax.block_until_ready(cnn_reference(x, params))

    assert out.shape == (2, 2), out.shape
    # bf16 matmul inputs (f32 accumulation) -> relaxed tolerance vs the f32 reference.
    assert jnp.allclose(out, ref, rtol=3e-2, atol=3e-2), (out, ref)
    print("KERNEL_OK")
</pallas_src>

<mosaic_0001>
module attributes {stable_mosaic.version = 11 : i64} {
  func.func @cnn_kernel(%arg0: i32, %arg1: memref<128x64xbf16, #tpu.memory_space<vmem>>, %arg2: memref<64x576xbf16, #tpu.memory_space<vmem>>, %arg3: memref<1x576xf32, #tpu.memory_space<vmem>>, %arg4: memref<576x512xbf16, #tpu.memory_space<vmem>>, %arg5: memref<1x512xf32, #tpu.memory_space<vmem>>, %arg6: memref<128x128xbf16, #tpu.memory_space<vmem>>, %arg7: memref<1x128xf32, #tpu.memory_space<vmem>>, %arg8: memref<2x128xbf16, #tpu.memory_space<vmem>>, %arg9: memref<2x1xf32, #tpu.memory_space<vmem>>, %arg10: memref<2x128xf32, #tpu.memory_space<vmem>>) attributes {dimension_semantics = [#tpu.dimension_semantics<parallel>], iteration_bounds = array<i64: 1>, scalar_prefetch = 0 : i64, scratch_operands = 0 : i64, tpu.core_type = #tpu.core_type<tc>, window_params = [{transform_indices = @transform_0, window_bounds = array<i64: 128, 64>}, {pipeline_mode = #tpu.pipeline_mode<synchronous>, transform_indices = @transform_1, window_bounds = array<i64: 64, 576>}, {pipeline_mode = #tpu.pipeline_mode<synchronous>, transform_indices = @transform_2, window_bounds = array<i64: 1, 576>}, {pipeline_mode = #tpu.pipeline_mode<synchronous>, transform_indices = @transform_3, window_bounds = array<i64: 576, 512>}, {pipeline_mode = #tpu.pipeline_mode<synchronous>, transform_indices = @transform_4, window_bounds = array<i64: 1, 512>}, {pipeline_mode = #tpu.pipeline_mode<synchronous>, transform_indices = @transform_5, window_bounds = array<i64: 128, 128>}, {pipeline_mode = #tpu.pipeline_mode<synchronous>, transform_indices = @transform_6, window_bounds = array<i64: 1, 128>}, {pipeline_mode = #tpu.pipeline_mode<synchronous>, transform_indices = @transform_7, window_bounds = array<i64: 2, 128>}, {pipeline_mode = #tpu.pipeline_mode<synchronous>, transform_indices = @transform_8, window_bounds = array<i64: 2, 1>}, {transform_indices = @transform_9, window_bounds = array<i64: 2, 128>}]} {
    %c0 = arith.constant 0 : index
    %c0_0 = arith.constant 0 : index
    %0 = vector.load %arg1[%c0, %c0_0] : memref<128x64xbf16, #tpu.memory_space<vmem>>, vector<128x64xbf16>
    %c0_1 = arith.constant 0 : index
    %c0_2 = arith.constant 0 : index
    %1 = vector.load %arg2[%c0_1, %c0_2] : memref<64x576xbf16, #tpu.memory_space<vmem>>, vector<64x576xbf16>
    %cst = arith.constant dense<0.000000e+00> : vector<128x576xf32>
    %2 = tpu.matmul %0, %1, %cst {dimension_numbers = #tpu.dot_dimension_numbers<[1], [0], [0], [1], [0, 0, 1, 1], [], []>} : vector<128x64xbf16>, vector<64x576xbf16>, vector<128x576xf32> -> vector<128x576xf32>
    %c0_3 = arith.constant 0 : index
    %c0_4 = arith.constant 0 : index
    %3 = vector.load %arg3[%c0_3, %c0_4] : memref<1x576xf32, #tpu.memory_space<vmem>>, vector<1x576xf32>
    %4 = vector.broadcast %3 : vector<1x576xf32> to vector<128x576xf32>
    %5 = arith.addf %2, %4 : vector<128x576xf32>
    %cst_5 = arith.constant 0.000000e+00 : f32
    %6 = vector.broadcast %cst_5 : f32 to vector<128x576xf32>
    %7 = arith.maximumf %5, %6 : vector<128x576xf32>
    %8 = arith.truncf %7 : vector<128x576xf32> to vector<128x576xbf16>
    %c0_6 = arith.constant 0 : index
    %c0_7 = arith.constant 0 : index
    %9 = vector.load %arg4[%c0_6, %c0_7] : memref<576x512xbf16, #tpu.memory_space<vmem>>, vector<576x512xbf16>
    %cst_8 = arith.constant dense<0.000000e+00> : vector<128x512xf32>
    %10 = tpu.matmul %8, %9, %cst_8 {dimension_numbers = #tpu.dot_dimension_numbers<[1], [0], [0], [1], [0, 0, 1, 1], [], []>} : vector<128x576xbf16>, vector<576x512xbf16>, vector<128x512xf32> -> vector<128x512xf32>
    %c0_9 = arith.constant 0 : index
    %c0_10 = arith.constant 0 : index
    %11 = vector.load %arg5[%c0_9, %c0_10] : memref<1x512xf32, #tpu.memory_space<vmem>>, vector<1x512xf32>
    %12 = vector.broadcast %11 : vector<1x512xf32> to vector<128x512xf32>
    %13 = arith.addf %10, %12 : vector<128x512xf32>
    %cst_11 = arith.constant 0.000000e+00 : f32
    %14 = vector.broadcast %cst_11 : f32 to vector<128x512xf32>
    %15 = arith.maximumf %13, %14 : vector<128x512xf32>
    %16 = vector.extract_strided_slice %15 {offsets = [0, 0], sizes = [128, 128], strides = [1, 1]} : vector<128x512xf32> to vector<128x128xf32>
    %17 = vector.extract_strided_slice %15 {offsets = [0, 128], sizes = [128, 128], strides = [1, 1]} : vector<128x512xf32> to vector<128x128xf32>
    %18 = arith.maximumf %16, %17 : vector<128x128xf32>
    %19 = vector.extract_strided_slice %15 {offsets = [0, 256], sizes = [128, 128], strides = [1, 1]} : vector<128x512xf32> to vector<128x128xf32>
    %20 = vector.extract_strided_slice %15 {offsets = [0, 384], sizes = [128, 128], strides = [1, 1]} : vector<128x512xf32> to vector<128x128xf32>
    %21 = arith.maximumf %19, %20 : vector<128x128xf32>
    %22 = arith.maximumf %18, %21 : vector<128x128xf32>
    %23 = arith.truncf %22 : vector<128x128xf32> to vector<128x128xbf16>
    %c0_12 = arith.constant 0 : index
    %c0_13 = arith.constant 0 : index
    %24 = vector.load %arg6[%c0_12, %c0_13] : memref<128x128xbf16, #tpu.memory_space<vmem>>, vector<128x128xbf16>
    %cst_14 = arith.constant dense<0.000000e+00> : vector<128x128xf32>
    %25 = tpu.matmul %23, %24, %cst_14 {dimension_numbers = #tpu.dot_dimension_numbers<[1], [0], [0], [1], [0, 0, 1, 1], [], []>} : vector<128x128xbf16>, vector<128x128xbf16>, vector<128x128xf32> -> vector<128x128xf32>
    %c0_15 = arith.constant 0 : index
    %c0_16 = arith.constant 0 : index
    %26 = vector.load %arg7[%c0_15, %c0_16] : memref<1x128xf32, #tpu.memory_space<vmem>>, vector<1x128xf32>
    %27 = vector.broadcast %26 : vector<1x128xf32> to vector<128x128xf32>
    %28 = arith.addf %25, %27 : vector<128x128xf32>
    %cst_17 = arith.constant 0.000000e+00 : f32
    %29 = vector.broadcast %cst_17 : f32 to vector<128x128xf32>
    %30 = arith.maximumf %28, %29 : vector<128x128xf32>
    %31 = arith.truncf %30 : vector<128x128xf32> to vector<128x128xbf16>
    %c0_18 = arith.constant 0 : index
    %c0_19 = arith.constant 0 : index
    %32 = vector.load %arg8[%c0_18, %c0_19] : memref<2x128xbf16, #tpu.memory_space<vmem>>, vector<2x128xbf16>
    %cst_20 = arith.constant dense<0.000000e+00> : vector<2x128xf32>
    %33 = tpu.matmul %32, %31, %cst_20 {dimension_numbers = #tpu.dot_dimension_numbers<[1], [1], [0], [0], [0, 0, 1, 0], [], []>} : vector<2x128xbf16>, vector<128x128xbf16>, vector<2x128xf32> -> vector<2x128xf32>
    %c0_21 = arith.constant 0 : index
    %c0_22 = arith.constant 0 : index
    %34 = vector.load %arg9[%c0_21, %c0_22] : memref<2x1xf32, #tpu.memory_space<vmem>>, vector<2x1xf32>
    %35 = vector.broadcast %34 : vector<2x1xf32> to vector<2x128xf32>
    %36 = arith.addf %33, %35 : vector<2x128xf32>
    %c0_23 = arith.constant 0 : index
    %c0_24 = arith.constant 0 : index
    %37 = vector.load %arg10[%c0_23, %c0_24] : memref<2x128xf32, #tpu.memory_space<vmem>>, vector<2x128xf32>
    tpu.vector_store %arg10[%c0_23, %c0_24], %36 {strides = array<i32>} : memref<2x128xf32, #tpu.memory_space<vmem>>, vector<2x128xf32>,
    return
  }
  func.func @transform_0(%arg0: i32) -> (i32, i32) {
    %c0_i32 = arith.constant 0 : i32
    %c0_i32_0 = arith.constant 0 : i32
    return %arg0, %c0_i32 : i32, i32
  }
  func.func @transform_1(%arg0: i32) -> (i32, i32) {
    %c0_i32 = arith.constant 0 : i32
    %c0_i32_0 = arith.constant 0 : i32
    %c0_i32_1 = arith.constant 0 : i32
    return %c0_i32, %c0_i32_0 : i32, i32
  }
  func.func @transform_2(%arg0: i32) -> (i32, i32) {
    %c0_i32 = arith.constant 0 : i32
    %c0_i32_0 = arith.constant 0 : i32
    %c0_i32_1 = arith.constant 0 : i32
    return %c0_i32, %c0_i32_0 : i32, i32
  }
  func.func @transform_3(%arg0: i32) -> (i32, i32) {
    %c0_i32 = arith.constant 0 : i32
    %c0_i32_0 = arith.constant 0 : i32
    %c0_i32_1 = arith.constant 0 : i32
    return %c0_i32, %c0_i32_0 : i32, i32
  }
  func.func @transform_4(%arg0: i32) -> (i32, i32) {
    %c0_i32 = arith.constant 0 : i32
    %c0_i32_0 = arith.constant 0 : i32
    %c0_i32_1 = arith.constant 0 : i32
    return %c0_i32, %c0_i32_0 : i32, i32
  }
  func.func @transform_5(%arg0: i32) -> (i32, i32) {
    %c0_i32 = arith.constant 0 : i32
    %c0_i32_0 = arith.constant 0 : i32
    %c0_i32_1 = arith.constant 0 : i32
    return %c0_i32, %c0_i32_0 : i32, i32
  }
  func.func @transform_6(%arg0: i32) -> (i32, i32) {
    %c0_i32 = arith.constant 0 : i32
    %c0_i32_0 = arith.constant 0 : i32
    %c0_i32_1 = arith.constant 0 : i32
    return %c0_i32, %c0_i32_0 : i32, i32
  }
  func.func @transform_7(%arg0: i32) -> (i32, i32) {
    %c0_i32 = arith.constant 0 : i32
    %c0_i32_0 = arith.constant 0 : i32
    %c0_i32_1 = arith.constant 0 : i32
    return %c0_i32, %c0_i32_0 : i32, i32
  }
  func.func @transform_8(%arg0: i32) -> (i32, i32) {
    %c0_i32 = arith.constant 0 : i32
    %c0_i32_0 = arith.constant 0 : i32
    %c0_i32_1 = arith.constant 0 : i32
    return %c0_i32, %c0_i32_0 : i32, i32
  }
  func.func @transform_9(%arg0: i32) -> (i32, i32) {
    %c0_i32 = arith.constant 0 : i32
    %c0_i32_0 = arith.constant 0 : i32
    return %c0_i32, %arg0 : i32, i32
  }
}

</mosaic_0001>

<bundles_post_ra>
// kernel: tpu_custom_call.1
= control target key start
LH: loop header
LB: loop body
LE: loop exit
PB: predicated region body
PF: predicated region fallthrough
CT: control target
= control target key end

     0   :  { %14 = vsyncpa [#allocation3], 0  ;;  %s4149_s0 = inlined_call_operand.vmem [shape: bf16[128,64], index: 0, kind: input, shape index: {}]   ;;  %s4150_s1 = inlined_call_operand.hbm [shape: bf16[64,576], index: 1, kind: input, shape index: {}]   ;;  %s4151_s2 = inlined_call_operand.vmem [shape: f32[1,576], index: 2, kind: input, shape index: {}]   ;;  %s4152_s3 = inlined_call_operand.hbm [shape: bf16[576,512], index: 3, kind: input, shape index: {}]   ;;  %s4153_s4 = inlined_call_operand.vmem [shape: f32[1,512], index: 4, kind: input, shape index: {}]   ;;  %s4154_s5 = inlined_call_operand.vmem [shape: bf16[128,128], index: 5, kind: input, shape index: {}]   ;;  %s4155_s6 = inlined_call_operand.vmem [shape: f32[1,128], index: 6, kind: input, shape index: {}]   ;;  %s4156_s7 = inlined_call_operand.vmem [shape: bf16[2,128], index: 7, kind: input, shape index: {}]   ;;  %s4157_s8 = inlined_call_operand.vmem [shape: f32[2,1], index: 8, kind: input, shape index: {}]   ;;  %s4158_s9 = inlined_call_operand.hbm [shape: f32[2,128], index: 9, kind: output, shape index: {}]  }
   0x1   :  { %15 = vsyncpa [#allocation6], 0 }
   0x2   :  { %16 = vsyncpa [#allocation4], 0  ;;  %s3582_s30 = smov [#allocation2]   ;;  %s3510_s13 = scalar_lea.hbm %s4150_s1, 2560 }
   0x3   :  { %s24_s10 = sshll.u32 %s3582_s30, 4  ;;  %p3511_p0 = scmp.ne.s32.totalorder %s4150_s1, %s3510_s13  ;;  %s25_s10 = int_to_ptr.vmem [resolvable:$true] %s24_s10 }
   0x4   :  { %p3514_p1 = scmp.lt.u32.totalorder %s3510_s13, %s4150_s1 }
   0x6   :  { %p3516_p2 = pnand %p3514_p1, %p3511_p0 }
   0x8   :  { %3519 = shalt.err (!%p3516_p2)
}
   0x9   :  { %s3520_s18 = scalar_lea.vmem %s25_s10, 2560  ;;  %p3525_p4 = scmp.lt.s32.totalorder %s25_s10, %s25_s10 }
   0xa   :  { %p3521_p3 = scmp.ne.s32.totalorder %s25_s10, %s3520_s18  ;;  %p3526_p5 = scmp.lt.s32.totalorder %s3520_s18, %s3520_s18 }
   0xc   :  { %p3527_p6 = por %p3526_p5, %p3525_p4 }
   0xe   :  { %p3528_p7 = pnand %p3527_p6, %p3521_p3 }
  0x10   :  { %3531 = shalt.err (!%p3528_p7)
}
  0x11   :  { %s3583_s19 = smov 320   ;;  %s3584_s20 = smov 20  }
  0x12   :  { %30 = dma.hbm_to_vmem [thread:$0]  %s4150_s1, 2560, %s25_s10, [#allocation3], %s3583_s19, %s3583_s19, %s3584_s20  }
  0x13   :  { %s3585_s23 = smov [#allocation5]   ;;  %s3532_s27 = scalar_lea.hbm %s4152_s3, 18432 }
  0x14   :  { %s38_s24 = sshll.u32 %s3585_s23, 4  ;;  %p3533_p8 = scmp.ne.s32.totalorder %s4152_s3, %s3532_s27  ;;  %s39_s24 = int_to_ptr.vmem [resolvable:$true] %s38_s24 }
  0x15   :  { %p3536_p9 = scmp.lt.u32.totalorder %s3532_s27, %s4152_s3 }
  0x17   :  { %p3538_p10 = pnand %p3536_p9, %p3533_p8 }
  0x19   :  { %3541 = shalt.err (!%p3538_p10)
}
  0x1a   :  { %s3542_s12 = scalar_lea.vmem %s39_s24, 18432  ;;  %p3547_p12 = scmp.lt.s32.totalorder %s39_s24, %s39_s24 }
  0x1b   :  { %p3543_p11 = scmp.ne.s32.totalorder %s39_s24, %s3542_s12  ;;  %p3548_p13 = scmp.lt.s32.totalorder %s3542_s12, %s3542_s12 }
  0x1d   :  { %p3549_p0 = por %p3548_p13, %p3547_p12 }
  0x1f   :  { %p3550_p1 = pnand %p3549_p0, %p3543_p11 }
  0x21   :  { %3553 = shalt.err (!%p3550_p1)
}
  0x22   :  { %s3586_s1 = smov 256   ;;  %s3587_s10 = smov 16  }
  0x23   :  { %44 = dma.hbm_to_vmem [thread:$0]  %s4152_s3, 18432, %s39_s24, [#allocation6], %s3586_s1, %s3586_s1, %s3587_s10  }
  0x24   :  { %3576 = dma.done.wait [#allocation3], 2560  }
  0x25   :  { %3577 = vsyncadd [#allocation3], 4294964736 }
  0x26   :  { %3578 = dma.done.wait [#allocation6], 18432  }
  0x27   :  { %3579 = vsyncadd [#allocation6], 4294948864  ;;  %v3588_v0 = vmov 0   ;;  %v3250_v1 = vld [vmem:[#allocation2 + $0x4] ss:$20 sps:$4 sm:$0xff]   ;;  %vm273_vm0 = vcmask 523264  }
  0x28   :  { %330 = vmatprep.mubr.bf16.mxu0 %v3588_v0  ;;  %390 = vmatprep.mubr.bf16.mxu1 %v3588_v0  ;;  %v3252_v2 = vld [vmem:[#allocation2] ss:$20 sps:$4 sm:$0xff]   ;;  %v3255_v4 = vld [vmem:[#allocation2 + $0x28] ss:$20 sps:$4 sm:$0xff]   ;;  %v3258_v6 = vld [vmem:[#allocation2 + $0x50] ss:$20 sps:$4 sm:$0xff]  }
  0x29   :  { %3249 = vset.pattern.permute.xlu0 %v3588_v0  ;;  %298 = vmatprep.subr.bf16.mxu0 %v3250_v1  ;;  %v3253_v3 = vld [vmem:[#allocation2 + $0x2c] ss:$20 sps:$4 sm:$0xff]   ;;  %v3256_v5 = vld [vmem:[#allocation2 + $0x54] ss:$20 sps:$4 sm:$0xff]   ;;  %v3259_v7 = vld [vmem:[#allocation2 + $0x7c] ss:$20 sps:$4 sm:$0xff]  }
  0x2a   :  { %3039 = vmatprep.subr.bf16.mxu1 %v3250_v1  ;;  %299 = vmatpush1.bf16.msra.mxu0 %v3252_v2  ;;  %v3261_v8 = vld [vmem:[#allocation2 + $0x78] ss:$20 sps:$4 sm:$0xff]   ;;  %v3672_v10 = vld [vmem:[%s4149_s0] sm:$0xff]   ;;  %v3677_v11 = vld [vmem:[%s4149_s0 + $0x30] sm:$0xff]   ;;  %vm3590_vm1 = vmmov 0   ;;  %s3591_s27 = smov [#allocation7]  }
  0x2b   :  { %3043 = vmatpush1.bf16.msra.mxu1 %v3252_v2  ;;  %300 = vmatprep.subr.bf16.mxu0 %v3253_v3  ;;  %v3271_v9 = vld [vmem:[#allocation2 + $0xc] ss:$20 sps:$4 sm:$0xff]   ;;  %v3269_v12 = vld [vmem:[#allocation2 + $0x8] ss:$20 sps:$4 sm:$0xff]   ;;  %v3272_v14 = vld [vmem:[#allocation2 + $0x30] ss:$20 sps:$4 sm:$0xff]  }
  0x2c   :  { %3040 = vmatprep.subr.bf16.mxu1 %v3253_v3  ;;  %v3274_v13 = vld [vmem:[#allocation2 + $0x34] ss:$20 sps:$4 sm:$0xff]   ;;  %v3278_v15 = vld [vmem:[#allocation2 + $0x5c] ss:$20 sps:$4 sm:$0xff]   ;;  %v3283_v17 = vld [vmem:[#allocation2 + $0x38] ss:$20 sps:$4 sm:$0xff]  }
  0x2d   :  { %v3282_v16 = vld [vmem:[#allocation2 + $0x10] ss:$20 sps:$4 sm:$0xff]   ;;  %v3688_v18 = vld [vmem:[%s4149_s0 + $0x8] sm:$0xff]   ;;  %v3693_v19 = vld [vmem:[%s4149_s0 + $0x38] sm:$0xff]   ;;  %s2695_s28 = sshll.u32 %s3591_s27, 4  ;;  %s2696_s28 = int_to_ptr.vmem [resolvable:$true] %s2695_s28 }
  0x2e   :  { %301 = vmatpush1.bf16.msra.mxu0 %v3255_v4  ;;  %v3276_v20 = vld [vmem:[#allocation2 + $0x58] ss:$20 sps:$4 sm:$0xff]   ;;  %v3284_v22 = vld [vmem:[#allocation2 + $0x60] ss:$20 sps:$4 sm:$0xff]   ;;  %v3285_v26 = vld [vmem:[#allocation2 + $0x88] ss:$20 sps:$4 sm:$0xff]   ;;  %p3559_p3 = scmp.lt.s32.totalorder %s2696_s28, %s2696_s28 }
  0x2f   :  { %3044 = vmatpush1.bf16.msra.mxu1 %v3255_v4  ;;  %302 = vmatprep.subr.bf16.mxu0 %v3256_v5  ;;  %v3281_v21 = vld [vmem:[#allocation2 + $0x84] ss:$20 sps:$4 sm:$0xff]   ;;  %v3279_v23 = vld [vmem:[#allocation2 + $0x80] ss:$20 sps:$4 sm:$0xff]   ;;  %v3291_v29 = vld [vmem:[#allocation5 + $0xc] ss:$16 sps:$4 sm:$0xff]  }
  0x30   :  { %3041 = vmatprep.subr.bf16.mxu1 %v3256_v5  ;;  %v3288_v24 = vld [vmem:[#allocation5 + $0x4] ss:$16 sps:$4 sm:$0xff]   ;;  %v3286_v27 = vld [vmem:[#allocation5] ss:$16 sps:$4 sm:$0xff]   ;;  %v3715_v32 = vld [vmem:[%s4149_s0 + $0x18] sm:$0xff]   ;;  %s3554_s29 = scalar_lea.vmem %s2696_s28, 32 }
  0x31   :  { %v3704_v25 = vld [vmem:[%s4149_s0 + $0x10] sm:$0xff]   ;;  %v3266_v37 = vld [vmem:[%s4149_s0 + $0x20] sm:$0xff]   ;;  %v3267_v42 = vld [vmem:[%s4149_s0 + $0x28] sm:$0xff]   ;;  %p3555_p2 = scmp.ne.s32.totalorder %s2696_s28, %s3554_s29  ;;  %p3560_p4 = scmp.lt.s32.totalorder %s3554_s29, %s3554_s29 }
  0x32   :  { %303 = vmatpush1.bf16.msra.mxu0 %v3258_v6  ;;  %v3294_v28 = vld [vmem:[#allocation5 + $0x24] ss:$16 sps:$4 sm:$0xff]   ;;  %v3292_v30 = vld [vmem:[#allocation5 + $0x20] ss:$16 sps:$4 sm:$0xff]   ;;  %v3289_v47 = vld [vmem:[#allocation5 + $0x8] ss:$16 sps:$4 sm:$0xff]  }
  0x33   :  { %3045 = vmatpush1.bf16.msra.mxu1 %v3258_v6  ;;  %304 = vmatprep.subr.bf16.mxu0 %v3259_v7  ;;  %v3300_v31 = vld [vmem:[#allocation5 + $0x44] ss:$16 sps:$4 sm:$0xff]   ;;  %v3298_v33 = vld [vmem:[#allocation5 + $0x40] ss:$16 sps:$4 sm:$0xff]   ;;  %v3297_v49 = vld [vmem:[#allocation5 + $0x2c] ss:$16 sps:$4 sm:$0xff]   ;;  %p3561_p5 = por %p3560_p4, %p3559_p3 }
  0x34   :  { %3042 = vmatprep.subr.bf16.mxu1 %v3259_v7  ;;  %v3306_v34 = vld [vmem:[#allocation5 + $0x64] ss:$16 sps:$4 sm:$0xff]   ;;  %v3304_v35 = vld [vmem:[#allocation5 + $0x60] ss:$16 sps:$4 sm:$0xff]   ;;  %v3295_v51 = vld [vmem:[#allocation5 + $0x28] ss:$16 sps:$4 sm:$0xff]  }
  0x35   :  { %v3312_v36 = vld [vmem:[#allocation5 + $0x84] ss:$16 sps:$4 sm:$0xff]   ;;  %v3310_v38 = vld [vmem:[#allocation5 + $0x80] ss:$16 sps:$4 sm:$0xff]   ;;  %v3303_v53 = vld [vmem:[#allocation5 + $0x4c] ss:$16 sps:$4 sm:$0xff]   ;;  %p3562_p6 = pnand %p3561_p5, %p3555_p2 }
  0x36   :  { %305 = vmatpush1.bf16.msra.mxu0 %v3261_v8  ;;  %v3318_v39 = vld [vmem:[#allocation5 + $0xa4] ss:$16 sps:$4 sm:$0xff]   ;;  %v3316_v40 = vld [vmem:[#allocation5 + $0xa0] ss:$16 sps:$4 sm:$0xff]   ;;  %v3301_v55 = vld [vmem:[#allocation5 + $0x48] ss:$16 sps:$4 sm:$0xff]  }
  0x37   :  { %3046 = vmatpush1.bf16.msra.mxu1 %v3261_v8  ;;  %2963 = vmatprep.subr.bf16.mxu0 %v3282_v16  ;;  %v3324_v41 = vld [vmem:[#allocation5 + $0xc4] ss:$16 sps:$4 sm:$0xff]   ;;  %v3322_v43 = vld [vmem:[#allocation5 + $0xc0] ss:$16 sps:$4 sm:$0xff]   ;;  %v3309_v57 = vld [vmem:[#allocation5 + $0x6c] ss:$16 sps:$4 sm:$0xff]  }
  0x38   :  { %411 = vmatprep.subr.bf16.mxu1 %v3271_v9  ;;  %v3330_v44 = vld [vmem:[#allocation5 + $0xe4] ss:$16 sps:$4 sm:$0xff]   ;;  %v3328_v45 = vld [vmem:[#allocation5 + $0xe0] ss:$16 sps:$4 sm:$0xff]   ;;  %v3307_v59 = vld [vmem:[#allocation5 + $0x68] ss:$16 sps:$4 sm:$0xff]  }
  0x39   :  { %2733 = vmatmul.mubr.msk.bf16.vlgmr.msra.gmra.mrb[0].mxu0 %vm273_vm0, %v3672_v10  ;;  %v3336_v46 = vld [vmem:[#allocation5 + $0x104] ss:$16 sps:$4 sm:$0xff]   ;;  %v3334_v48 = vld [vmem:[#allocation5 + $0x100] ss:$16 sps:$4 sm:$0xff]   ;;  %v3315_v61 = vld [vmem:[#allocation5 + $0x8c] ss:$16 sps:$4 sm:$0xff]  }
  0x3a   :  { %2739 = vmatmul.mubr.msk.bf16.vlgmr.msra.gmra.mrb[0].mxu1 %vm273_vm0, %v3677_v11  ;;  %340 = vmatprep.mubr.bf16.mxu0 %v3588_v0  ;;  %v3342_v50 = vld [vmem:[#allocation5 + $0x124] ss:$16 sps:$4 sm:$0xff]   ;;  %v3340_v52 = vld [vmem:[#allocation5 + $0x120] ss:$16 sps:$4 sm:$0xff]   ;;  %v3313_v63 = vld [vmem:[#allocation5 + $0x88] ss:$16 sps:$4 sm:$0xff]  }
  0x3b   :  { %412 = vmatpush1.bf16.msra.mxu1 %v3269_v12  ;;  %400 = vmatprep.mubr.bf16.mxu1 %v3588_v0  ;;  %v3348_v54 = vld [vmem:[#allocation5 + $0x144] ss:$16 sps:$4 sm:$0xff]   ;;  %v3346_v56 = vld [vmem:[#allocation5 + $0x140] ss:$16 sps:$4 sm:$0xff]   ;;  %v3321_v2 = vld [vmem:[#allocation5 + $0xac] ss:$16 sps:$4 sm:$0xff]  }
  0x3c   :  { %413 = vmatprep.subr.bf16.mxu1 %v3274_v13  ;;  %2964 = vmatpush3.bf16.msra.mxu0 %v3282_v16  ;;  %v3354_v58 = vld [vmem:[#allocation5 + $0x164] ss:$16 sps:$4 sm:$0xff]   ;;  %v3352_v60 = vld [vmem:[#allocation5 + $0x160] ss:$16 sps:$4 sm:$0xff]   ;;  %v3319_v4 = vld [vmem:[#allocation5 + $0xa8] ss:$16 sps:$4 sm:$0xff]  }
  0x3d   :  { %2965 = vmatprep.subr.bf16.mxu0 %v3283_v17  ;;  %v3360_v62 = vld [vmem:[#allocation5 + $0x184] ss:$16 sps:$4 sm:$0xff]   ;;  %v3358_v1 = vld [vmem:[#allocation5 + $0x180] ss:$16 sps:$4 sm:$0xff]   ;;  %v3327_v6 = vld [vmem:[#allocation5 + $0xcc] ss:$16 sps:$4 sm:$0xff]  }
  0x3e   :  { %v3366_v3 = vld [vmem:[#allocation5 + $0x1a4] ss:$16 sps:$4 sm:$0xff]   ;;  %v3364_v5 = vld [vmem:[#allocation5 + $0x1a0] ss:$16 sps:$4 sm:$0xff]   ;;  %v3325_v7 = vld [vmem:[#allocation5 + $0xc8] ss:$16 sps:$4 sm:$0xff]  }
  0x3f   :  { %414 = vmatpush1.bf16.msra.mxu1 %v3272_v14  ;;  %v3333_v8 = vld [vmem:[#allocation5 + $0xec] ss:$16 sps:$4 sm:$0xff]   ;;  %v3331_v9 = vld [vmem:[#allocation5 + $0xe8] ss:$16 sps:$4 sm:$0xff]   ;;  %v3370_v16 = vld [vmem:[#allocation5 + $0x1c0] ss:$16 sps:$4 sm:$0xff]  }
  0x40   :  { %415 = vmatprep.subr.bf16.mxu1 %v3278_v15  ;;  %2966 = vmatpush3.bf16.msra.mxu0 %v3283_v17  ;;  %v3345_v12 = vld [vmem:[#allocation5 + $0x12c] ss:$16 sps:$4 sm:$0xff]   ;;  %v3343_v13 = vld [vmem:[#allocation5 + $0x128] ss:$16 sps:$4 sm:$0xff]   ;;  %v3372_v15 = vld [vmem:[#allocation5 + $0x1c4] ss:$16 sps:$4 sm:$0xff]  }
  0x41   :  { %2734 = vmatmul.mubr.msk.bf16.gmra.mrb[4].mxu0 %vm273_vm0, %v3688_v18  ;;  %2967 = vmatprep.subr.bf16.mxu0 %v3284_v22  ;;  %v3351_v14 = vld [vmem:[#allocation5 + $0x14c] ss:$16 sps:$4 sm:$0xff]   ;;  %v3349_v17 = vld [vmem:[#allocation5 + $0x148] ss:$16 sps:$4 sm:$0xff]  }
  0x42   :  { %2740 = vmatmul.mubr.msk.bf16.gmra.mrb[4].mxu1 %vm273_vm0, %v3693_v19  ;;  %350 = vmatprep.mubr.bf16.mxu0 %v3588_v0 }
  0x43   :  { %416 = vmatpush1.bf16.msra.mxu1 %v3276_v20  ;;  %443 = vmatprep.mubr.bf16.mxu1 %v3588_v0  ;;  %v3376_v20 = vld [vmem:[#allocation5 + $0x1e0] ss:$16 sps:$4 sm:$0xff]  }
  0x44   :  { %417 = vmatprep.subr.bf16.mxu1 %v3281_v21  ;;  %2968 = vmatpush3.bf16.msra.mxu0 %v3284_v22  ;;  %v3355_v21 = vld [vmem:[#allocation5 + $0x168] ss:$16 sps:$4 sm:$0xff]   ;;  %v3363_v22 = vld [vmem:[#allocation5 + $0x18c] ss:$16 sps:$4 sm:$0xff]  }
  0x45   :  { %2969 = vmatprep.subr.bf16.mxu0 %v3285_v26 }
  0x47   :  { %418 = vmatpush1.bf16.msra.mxu1 %v3279_v23  ;;  %v3384_v23 = vld [vmem:[#allocation5 + $0x204] ss:$16 sps:$4 sm:$0xff]  }
  0x48   :  { %1651 = vmatprep.subr.bf16.mxu1 %v3288_v24  ;;  %2970 = vmatpush3.bf16.msra.mxu0 %v3285_v26  ;;  %v3361_v24 = vld [vmem:[#allocation5 + $0x188] ss:$16 sps:$4 sm:$0xff]  }
  0x49   :  { %2735 = vmatmul.mubr.msk.bf16.gmra.mrb[8].mxu0 %vm273_vm0, %v3704_v25  ;;  %1990 = vmatprep.subr.bf16.mxu0 %v3291_v29  ;;  %v3367_v26 = vld [vmem:[#allocation5 + $0x1a8] ss:$16 sps:$4 sm:$0xff]   ;;  %v3381_v29 = vld [vmem:[#allocation5 + $0x1ec] ss:$16 sps:$4 sm:$0xff]  }
  0x4a   :  { %2741 = vmatmul.mubr.msk.bf16.vlgmr.msra.gmra.mrb[8].mxu1 %vm273_vm0, %v3672_v10  ;;  %360 = vmatprep.mubr.bf16.mxu0 %v3588_v0 }
  0x4b   :  { %453 = vmatprep.mubr.bf16.mxu1 %v3588_v0  ;;  %1652 = vmatpush1.bf16.msra.mxu1 %v3286_v27  ;;  %v3375_v27 = vld [vmem:[#allocation5 + $0x1cc] ss:$16 sps:$4 sm:$0xff]  }
  0x4c   :  { %1653 = vmatprep.subr.bf16.mxu1 %v3294_v28  ;;  %v3373_v28 = vld [vmem:[#allocation5 + $0x1c8] ss:$16 sps:$4 sm:$0xff]  }
  0x4f   :  { %1654 = vmatpush1.bf16.msra.mxu1 %v3292_v30  ;;  %v3379_v30 = vld [vmem:[#allocation5 + $0x1e8] ss:$16 sps:$4 sm:$0xff]  }
  0x50   :  { %1655 = vmatprep.subr.bf16.mxu1 %v3300_v31  ;;  %v3387_v31 = vld [vmem:[#allocation5 + $0x20c] ss:$16 sps:$4 sm:$0xff]  }
  0x51   :  { %2736 = vmatmul.mubr.msk.bf16.gmra.mrb[12].mxu0 %vm273_vm0, %v3715_v32 }
  0x52   :  { %2742 = vmatmul.mubr.msk.bf16.gmra.mrb[12].mxu1 %vm273_vm0, %v3688_v18  ;;  %370 = vmatprep.mubr.bf16.mxu0 %v3588_v0 }
  0x53   :  { %463 = vmatprep.mubr.bf16.mxu1 %v3588_v0  ;;  %1656 = vmatpush1.bf16.msra.mxu1 %v3298_v33 }
  0x54   :  { %1657 = vmatprep.subr.bf16.mxu1 %v3306_v34 }
  0x57   :  { %1658 = vmatpush1.bf16.msra.mxu1 %v3304_v35  ;;  %v3767_v35 = vld [vmem:[%s4151_s2] sm:$0x1f] }
  0x58   :  { %1659 = vmatprep.subr.bf16.mxu1 %v3312_v36 }
  0x59   :  { %2737 = vmatmul.mubr.msk.bf16.gmra.mrb[16].mxu0 %vm273_vm0, %v3266_v37 }
  0x5a   :  { %2743 = vmatmul.mubr.msk.bf16.gmra.mrb[16].mxu1 %vm273_vm0, %v3704_v25  ;;  %380 = vmatprep.mubr.bf16.mxu0 %v3588_v0 }
  0x5b   :  { %473 = vmatprep.mubr.bf16.mxu1 %v3588_v0  ;;  %1660 = vmatpush1.bf16.msra.mxu1 %v3310_v38 }
  0x5c   :  { %1661 = vmatprep.subr.bf16.mxu1 %v3318_v39 }
  0x5f   :  { %1662 = vmatpush1.bf16.msra.mxu1 %v3316_v40 }
  0x60   :  { %1663 = vmatprep.subr.bf16.mxu1 %v3324_v41 }
  0x61   :  { %2738 = vmatmul.mubr.msk.bf16.gmra.mrb[20].mxu0 %vm273_vm0, %v3267_v42 }
  0x62   :  { %2744 = vmatmul.mubr.msk.bf16.gmra.mrb[20].mxu1 %vm273_vm0, %v3715_v32  ;;  %2971 = vmatprep.mubr.msk.bf16.mxu0 %vm273_vm0, %v3672_v10  ;;  %v3339_v10 = vld [vmem:[#allocation5 + $0x10c] ss:$16 sps:$4 sm:$0xff]  }
  0x63   :  { %483 = vmatprep.mubr.bf16.mxu1 %v3588_v0  ;;  %1664 = vmatpush1.bf16.msra.mxu1 %v3322_v43 }
  0x64   :  { %1665 = vmatprep.subr.bf16.mxu1 %v3330_v44 }
  0x67   :  { %1666 = vmatpush1.bf16.msra.mxu1 %v3328_v45 }
  0x68   :  { %1667 = vmatprep.subr.bf16.mxu1 %v3336_v46 }
  0x69   :  { %2972 = vmatmul.mubr.msk.bf16.vlgmr.msra.gmra.mrb[24].mxu0 %vm273_vm0, %v3688_v18  ;;  %v3357_v18 = vld [vmem:[#allocation5 + $0x16c] ss:$16 sps:$4 sm:$0xff]  }
  0x6a   :  { %2745 = vmatmul.mubr.msk.bf16.gmra.mrb[24].mxu1 %vm273_vm0, %v3266_v37  ;;  %2975 = vmatprep.mubr.msk.bf16.mxu0 %vm273_vm0, %v3704_v25  ;;  %v3369_v25 = vld [vmem:[#allocation5 + $0x1ac] ss:$16 sps:$4 sm:$0xff]  }
  0x6b   :  { %493 = vmatprep.mubr.bf16.mxu1 %v3588_v0  ;;  %1991 = vmatpush1.bf16.msra.mxu0 %v3289_v47 }
  0x6c   :  { %1668 = vmatpush1.bf16.msra.mxu1 %v3334_v48  ;;  %1992 = vmatprep.subr.bf16.mxu0 %v3297_v49 }
  0x6d   :  { %1669 = vmatprep.subr.bf16.mxu1 %v3342_v50 }
  0x6f   :  { %1993 = vmatpush1.bf16.msra.mxu0 %v3295_v51 }
  0x70   :  { %1670 = vmatpush1.bf16.msra.mxu1 %v3340_v52  ;;  %1994 = vmatprep.subr.bf16.mxu0 %v3303_v53 }
  0x71   :  { %1671 = vmatprep.subr.bf16.mxu1 %v3348_v54  ;;  %2976 = vmatmul.mubr.msk.bf16.gmra.mrb[28].mxu0 %vm273_vm0, %v3715_v32  ;;  %v104_v32 = vlaneseq }
  0x72   :  { %2746 = vmatmul.mubr.msk.bf16.gmra.mrb[28].mxu1 %vm273_vm0, %v3267_v42  ;;  %2979 = vmatprep.mubr.msk.bf16.mxu0 %vm273_vm0, %v3266_v37 }
  0x73   :  { %503 = vmatprep.mubr.bf16.mxu1 %v3588_v0  ;;  %1995 = vmatpush1.bf16.msra.mxu0 %v3301_v55  ;;  %v3761_v33 = vshrl.u32 %v104_v32, 7 }
  0x74   :  { %1672 = vmatpush1.bf16.msra.mxu1 %v3346_v56  ;;  %1996 = vmatprep.subr.bf16.mxu0 %v3309_v57 }
  0x75   :  { %1673 = vmatprep.subr.bf16.mxu1 %v3354_v58  ;;  %v106_v34 = vsub.s32 0, %v3761_v33  ;;  %v110_v36 = vsub.s32 1, %v3761_v33 }
  0x77   :  { %1997 = vmatpush1.bf16.msra.mxu0 %v3307_v59  ;;  %v3773_v37 = vrot.slane %v3767_v35, %v106_v34  ;;  %v3778_v38 = vrot.slane %v3767_v35, %v110_v36 }
  0x78   :  { %1674 = vmatpush1.bf16.msra.mxu1 %v3352_v60  ;;  %1998 = vmatprep.subr.bf16.mxu0 %v3315_v61 }
  0x79   :  { %1675 = vmatprep.subr.bf16.mxu1 %v3360_v62  ;;  %2980 = vmatmul.mubr.msk.bf16.gmra.mrb[32].mxu0 %vm273_vm0, %v3267_v42 }
  0x7a   :  { %2747 = vmatmul.mubr.msk.bf16.gmra.mrb[32].mxu1 %vm273_vm0, %v3677_v11  ;;  %2983 = vmatprep.mubr.msk.bf16.mxu0 %vm273_vm0, %v3677_v11  ;;  %v3337_v11 = vld [vmem:[#allocation5 + $0x108] ss:$16 sps:$4 sm:$0xff]  }
  0x7b   :  { %513 = vmatprep.mubr.bf16.mxu1 %v3588_v0  ;;  %1999 = vmatpush1.bf16.msra.mxu0 %v3313_v63 }
  0x7c   :  { %1676 = vmatpush1.bf16.msra.mxu1 %v3358_v1  ;;  %2000 = vmatprep.subr.bf16.mxu0 %v3321_v2  ;;  %v3382_v1 = vld [vmem:[#allocation5 + $0x200] ss:$16 sps:$4 sm:$0xff]  }
  0x7d   :  { %1677 = vmatprep.subr.bf16.mxu1 %v3366_v3 }
  0x7f   :  { %2001 = vmatpush1.bf16.msra.mxu0 %v3319_v4 }
  0x80   :  { %1678 = vmatpush1.bf16.msra.mxu1 %v3364_v5  ;;  %2002 = vmatprep.subr.bf16.mxu0 %v3327_v6  ;;  %v3385_v5 = vld [vmem:[#allocation5 + $0x208] ss:$16 sps:$4 sm:$0xff]   ;;  %v3390_v6 = vld [vmem:[#allocation5 + $0x224] ss:$16 sps:$4 sm:$0xff]  }
  0x81   :  { %2984 = vmatmul.mubr.msk.bf16.gmra.mrb[36].mxu0 %vm273_vm0, %v3693_v19  ;;  %1679 = vmatprep.subr.bf16.mxu1 %v3372_v15 }
  0x82   :  { %2748 = vmatmul.mubr.msk.bf16.gmra.mrb[36].mxu1 %vm273_vm0, %v3693_v19  ;;  %v3378_v19 = vld [vmem:[#allocation5 + $0x1e4] ss:$16 sps:$4 sm:$0xff]  }
  0x83   :  { %2003 = vmatpush1.bf16.msra.mxu0 %v3325_v7 }
  0x84   :  { %2004 = vmatprep.subr.bf16.mxu0 %v3333_v8  ;;  %1680 = vmatpush1.bf16.msra.mxu1 %v3370_v16 }
  0x85   :  { %1681 = vmatprep.subr.bf16.mxu1 %v3378_v19  ;;  %v118_v19 = vsub.s32 3, %v3761_v33 }
  0x87   :  { %2005 = vmatpush1.bf16.msra.mxu0 %v3331_v9 }
  0x88   :  { %2006 = vmatprep.subr.bf16.mxu0 %v3339_v10  ;;  %1682 = vmatpush1.bf16.msra.mxu1 %v3376_v20 }
  0x89   :  { %1764 = vmatprep.subr.bf16.mxu1 %v3384_v23 }
  0x8b   :  { %2007 = vmatpush1.bf16.msra.mxu0 %v3337_v11  ;;  %v3393_v11 = vld [vmem:[#allocation5 + $0x22c] ss:$16 sps:$4 sm:$0xff]  }
  0x8c   :  { %2008 = vmatprep.subr.bf16.mxu0 %v3345_v12 }
  0x8f   :  { %2009 = vmatpush1.bf16.msra.mxu0 %v3343_v13 }
  0x90   :  { %2010 = vmatprep.subr.bf16.mxu0 %v3351_v14  ;;  %v114_v14 = vsub.s32 2, %v3761_v33 }
  0x93   :  { %2011 = vmatpush1.bf16.msra.mxu0 %v3349_v17 }
  0x94   :  { %2012 = vmatprep.subr.bf16.mxu0 %v3357_v18 }
  0x97   :  { %2013 = vmatpush1.bf16.msra.mxu0 %v3355_v21 }
  0x98   :  { %2014 = vmatprep.subr.bf16.mxu0 %v3363_v22  ;;  %v3388_v22 = vld [vmem:[#allocation5 + $0x220] ss:$16 sps:$4 sm:$0xff]  }
  0x9b   :  { %2015 = vmatpush1.bf16.msra.mxu0 %v3361_v24 }
  0x9c   :  { %2016 = vmatprep.subr.bf16.mxu0 %v3369_v25 }
  0x9f   :  { %2017 = vmatpush1.bf16.msra.mxu0 %v3367_v26 }
  0xa0   :  { %2018 = vmatprep.subr.bf16.mxu0 %v3375_v27  ;;  %v3391_v27 = vld [vmem:[#allocation5 + $0x228] ss:$16 sps:$4 sm:$0xff]  }
  0xa3   :  { %2019 = vmatpush1.bf16.msra.mxu0 %v3373_v28  ;;  %v3396_v28 = vld [vmem:[#allocation5 + $0x244] ss:$16 sps:$4 sm:$0xff]  }
  0xa4   :  { %2020 = vmatprep.subr.bf16.mxu0 %v3381_v29 }
  0xa7   :  { %2021 = vmatpush1.bf16.msra.mxu0 %v3379_v30 }
  0xa8   :  { %2103 = vmatprep.subr.bf16.mxu0 %v3387_v31 }
 0x10c   :  { %v332_v39 = vpop.f32.mrb[0].mxu0 }
 0x10d   :  { %v392_v40 = vpop.f32.mrb[0].mxu1  ;;  %v333_v41 = vadd.f32 %v332_v39, %v3773_v37  ;;  %v334_v42 = vpop.f32.mrb[1].mxu0  ;;  %v3399_v39 = vld [vmem:[#allocation5 + $0x24c] ss:$16 sps:$4 sm:$0xff]  }
 0x10e   :  { %v393_v43 = vadd.f32 %v392_v40, %v3773_v37  ;;  %v394_v44 = vpop.f32.mrb[1].mxu1  ;;  %v335_v45 = vadd.f32 %v334_v42, %v3778_v38  ;;  %v336_v46 = vpop.f32.mrb[2].mxu0 }
 0x10f   :  { %v395_v47 = vadd.f32 %v394_v44, %v3778_v38  ;;  %v396_v48 = vpop.f32.mrb[2].mxu1  ;;  %v337_v49 = vadd.f32 %v336_v46, %v3773_v37  ;;  %v338_v50 = vpop.f32.mrb[3].mxu0  ;;  %v621_v57 = vmax.f32 %v333_v41, 0.0  ;;  %v3805_v41 = vrot.slane %v3767_v35, %v114_v14 }
 0x110   :  { %v681_v51 = vmax.f32 %v393_v43, 0.0  ;;  %v397_v52 = vadd.f32 %v396_v48, %v3773_v37  ;;  %v398_v53 = vpop.f32.mrb[3].mxu1  ;;  %v339_v54 = vadd.f32 %v338_v50, %v3778_v38  ;;  %v622_v60 = vmax.f32 %v335_v45, 0.0  ;;  %v3394_v50 = vld [vmem:[#allocation5 + $0x240] ss:$16 sps:$4 sm:$0xff]  }
 0x111   :  { %v682_v55 = vmax.f32 %v395_v47, 0.0  ;;  %v399_v56 = vadd.f32 %v398_v53, %v3778_v38  ;;  %v626_v58 = vmax.f32 %v337_v49, 0.0  ;;  %v3810_v45 = vrot.slane %v3767_v35, %v118_v19 }
 0x112   :  { %v686_v59 = vmax.f32 %v397_v52, 0.0  ;;  %v627_v61 = vmax.f32 %v339_v54, 0.0 }
 0x113   :  { %v687_v62 = vmax.f32 %v399_v56, 0.0  ;;  %v701_v63 = vpack.c.bf16 %v626_v58, %v621_v57  ;;  %v3402_v56 = vld [vmem:[#allocation5 + $0x264] ss:$16 sps:$4 sm:$0xff]   ;;  %v3405_v57 = vld [vmem:[#allocation5 + $0x26c] ss:$16 sps:$4 sm:$0xff]  }
 0x114   :  { %v3788_v2 = vpack.c.bf16 %v686_v59, %v681_v51  ;;  %v702_v3 = vpack.c.bf16 %v627_v61, %v622_v60  ;;  %v342_v4 = vpop.f32.mrb[4].mxu0  ;;  %v3397_v51 = vld [vmem:[#allocation5 + $0x248] ss:$16 sps:$4 sm:$0xff]  }
 0x115   :  { %v3790_v7 = vpack.c.bf16 %v687_v62, %v682_v55  ;;  %v402_v8 = vpop.f32.mrb[4].mxu1  ;;  %v343_v9 = vadd.f32 %v342_v4, %v3773_v37  ;;  %v344_v10 = vpop.f32.mrb[5].mxu0  ;;  %v3400_v4 = vld [vmem:[#allocation5 + $0x260] ss:$16 sps:$4 sm:$0xff]  }
 0x116   :  { %v403_v12 = vadd.f32 %v402_v8, %v3773_v37  ;;  %v404_v13 = vpop.f32.mrb[5].mxu1  ;;  %v345_v15 = vadd.f32 %v344_v10, %v3778_v38  ;;  %v346_v16 = vpop.f32.mrb[6].mxu0  ;;  %1683 = vmatprep.mubr.bf16.mxu1 %v702_v3  ;;  %2022 = vmatprep.mubr.bf16.mxu0 %v702_v3  ;;  %v3403_v10 = vld [vmem:[#allocation5 + $0x268] ss:$16 sps:$4 sm:$0xff]  }
 0x117   :  { %v405_v17 = vadd.f32 %v404_v13, %v3778_v38  ;;  %v406_v18 = vpop.f32.mrb[6].mxu1  ;;  %v347_v20 = vadd.f32 %v346_v16, %v3773_v37  ;;  %v348_v21 = vpop.f32.mrb[7].mxu0  ;;  %1684 = vmatmul.mubr.bf16.vlgmr.msra.gmra.mrb[40].mxu1 %v701_v63  ;;  %2023 = vmatmul.mubr.bf16.vlgmr.msra.gmra.mrb[40].mxu0 %v701_v63  ;;  %v631_v31 = vmax.f32 %v343_v9, 0.0 }
 0x118   :  { %v691_v23 = vmax.f32 %v403_v12, 0.0  ;;  %v407_v24 = vadd.f32 %v406_v18, %v3773_v37  ;;  %v408_v25 = vpop.f32.mrb[7].mxu1  ;;  %v349_v26 = vadd.f32 %v348_v21, %v3778_v38  ;;  %1765 = vmatpush1.bf16.msra.mxu1 %v3382_v1  ;;  %2104 = vmatpush1.bf16.msra.mxu0 %v3385_v5  ;;  %v632_v42 = vmax.f32 %v345_v15, 0.0 }
 0x119   :  { %v692_v29 = vmax.f32 %v405_v17, 0.0  ;;  %v409_v30 = vadd.f32 %v408_v25, %v3778_v38  ;;  %v636_v32 = vmax.f32 %v347_v20, 0.0  ;;  %1766 = vmatprep.subr.bf16.mxu1 %v3390_v6  ;;  %2105 = vmatprep.subr.bf16.mxu0 %v3393_v11  ;;  %v3408_v11 = vld [vmem:[#allocation5 + $0x284] ss:$16 sps:$4 sm:$0xff]   ;;  %v3411_v17 = vld [vmem:[#allocation5 + $0x28c] ss:$16 sps:$4 sm:$0xff]  }
 0x11a   :  { %v696_v40 = vmax.f32 %v407_v24, 0.0  ;;  %v637_v43 = vmax.f32 %v349_v26, 0.0 }
 0x11b   :  { %v697_v44 = vmax.f32 %v409_v30, 0.0  ;;  %v706_v46 = vpack.c.bf16 %v636_v32, %v631_v31 }
 0x11c   :  { %v3812_v47 = vpack.c.bf16 %v696_v40, %v691_v23  ;;  %v707_v48 = vpack.c.bf16 %v637_v43, %v632_v42  ;;  %v352_v49 = vpop.f32.mrb[8].mxu0  ;;  %1767 = vmatpush1.bf16.msra.mxu1 %v3388_v22  ;;  %2106 = vmatpush1.bf16.msra.mxu0 %v3391_v27  ;;  %v3406_v27 = vld [vmem:[#allocation5 + $0x280] ss:$16 sps:$4 sm:$0xff]   ;;  %v3417_v40 = vld [vmem:[#allocation5 + $0x2ac] ss:$16 sps:$4 sm:$0xff]  }
 0x11d   :  { %v3814_v52 = vpack.c.bf16 %v697_v44, %v692_v29  ;;  %v445_v53 = vpop.f32.mrb[8].mxu1  ;;  %v353_v54 = vadd.f32 %v352_v49, %v3773_v37  ;;  %v354_v55 = vpop.f32.mrb[9].mxu0  ;;  %1768 = vmatprep.subr.bf16.mxu1 %v3396_v28  ;;  %2107 = vmatprep.subr.bf16.mxu0 %v3399_v39  ;;  %v3409_v28 = vld [vmem:[#allocation5 + $0x288] ss:$16 sps:$4 sm:$0xff]   ;;  %v3414_v39 = vld [vmem:[#allocation5 + $0x2a4] ss:$16 sps:$4 sm:$0xff]  }
 0x11e   :  { %v446_v58 = vadd.f32 %v445_v53, %v3805_v41  ;;  %v447_v59 = vpop.f32.mrb[9].mxu1  ;;  %v355_v60 = vadd.f32 %v354_v55, %v3778_v38  ;;  %v356_v61 = vpop.f32.mrb[10].mxu0  ;;  %1693 = vmatprep.mubr.bf16.mxu1 %v707_v48  ;;  %2032 = vmatprep.mubr.bf16.mxu0 %v707_v48  ;;  %v3412_v53 = vld [vmem:[#allocation5 + $0x2a0] ss:$16 sps:$4 sm:$0xff]  }
 0x11f   :  { %v448_v62 = vadd.f32 %v447_v59, %v3810_v45  ;;  %v449_v63 = vpop.f32.mrb[10].mxu1  ;;  %v357_v1 = vadd.f32 %v356_v61, %v3773_v37  ;;  %v358_v3 = vpop.f32.mrb[11].mxu0  ;;  %1694 = vmatmul.mubr.bf16.gmra.mrb[44].mxu1 %v706_v46  ;;  %2033 = vmatmul.mubr.bf16.gmra.mrb[44].mxu0 %v706_v46  ;;  %v641_v15 = vmax.f32 %v353_v54, 0.0  ;;  %v3420_v59 = vld [vmem:[#allocation5 + $0x2c4] ss:$16 sps:$4 sm:$0xff]  }
 0x120   :  { %v623_v5 = vmax.f32 %v446_v58, 0.0  ;;  %v450_v6 = vadd.f32 %v449_v63, %v3805_v41  ;;  %v451_v8 = vpop.f32.mrb[11].mxu1  ;;  %v359_v9 = vadd.f32 %v358_v3, %v3778_v38  ;;  %1769 = vmatpush1.bf16.msra.mxu1 %v3394_v50  ;;  %2108 = vmatpush1.bf16.msra.mxu0 %v3397_v51  ;;  %v642_v20 = vmax.f32 %v355_v60, 0.0  ;;  %v3415_v58 = vld [vmem:[#allocation5 + $0x2a8] ss:$16 sps:$4 sm:$0xff]  }
 0x121   :  { %v624_v12 = vmax.f32 %v448_v62, 0.0  ;;  %v452_v13 = vadd.f32 %v451_v8, %v3810_v45  ;;  %v646_v16 = vmax.f32 %v357_v1, 0.0  ;;  %1770 = vmatprep.subr.bf16.mxu1 %v3402_v56  ;;  %2109 = vmatprep.subr.bf16.mxu0 %v3405_v57  ;;  %v3423_v1 = vld [vmem:[#allocation5 + $0x2cc] ss:$16 sps:$4 sm:$0xff]  }
 0x122   :  { %v628_v18 = vmax.f32 %v450_v6, 0.0  ;;  %v647_v21 = vmax.f32 %v359_v9, 0.0 }
 0x123   :  { %v629_v22 = vmax.f32 %v452_v13, 0.0  ;;  %v711_v23 = vpack.c.bf16 %v646_v16, %v641_v15  ;;  %v3421_v13 = vld [vmem:[#allocation5 + $0x2c8] ss:$16 sps:$4 sm:$0xff]  }
 0x124   :  { %v3824_v24 = vpack.c.bf16 %v628_v18, %v623_v5  ;;  %v712_v25 = vpack.c.bf16 %v647_v21, %v642_v20  ;;  %v362_v26 = vpop.f32.mrb[12].mxu0  ;;  %1771 = vmatpush1.bf16.msra.mxu1 %v3400_v4  ;;  %2110 = vmatpush1.bf16.msra.mxu0 %v3403_v10  ;;  %v3426_v20 = vld [vmem:[#allocation5 + $0x2e4] ss:$16 sps:$4 sm:$0xff]   ;;  %v3429_v21 = vld [vmem:[#allocation5 + $0x2ec] ss:$16 sps:$4 sm:$0xff]  }
 0x125   :  { %v3826_v29 = vpack.c.bf16 %v629_v22, %v624_v12  ;;  %v455_v30 = vpop.f32.mrb[12].mxu1  ;;  %v363_v31 = vadd.f32 %v362_v26, %v3773_v37  ;;  %v364_v32 = vpop.f32.mrb[13].mxu0  ;;  %1772 = vmatprep.subr.bf16.mxu1 %v3408_v11  ;;  %2111 = vmatprep.subr.bf16.mxu0 %v3411_v17  ;;  %v3418_v12 = vld [vmem:[#allocation5 + $0x2c0] ss:$16 sps:$4 sm:$0xff]  }
 0x126   :  { %v456_v42 = vadd.f32 %v455_v30, %v3805_v41  ;;  %v457_v43 = vpop.f32.mrb[13].mxu1  ;;  %v365_v44 = vadd.f32 %v364_v32, %v3778_v38  ;;  %v366_v46 = vpop.f32.mrb[14].mxu0  ;;  %1703 = vmatprep.mubr.bf16.mxu1 %v712_v25  ;;  %2042 = vmatprep.mubr.bf16.mxu0 %v712_v25  ;;  %v3424_v32 = vld [vmem:[#allocation5 + $0x2e0] ss:$16 sps:$4 sm:$0xff]  }
 0x127   :  { %v458_v48 = vadd.f32 %v457_v43, %v3810_v45  ;;  %v459_v49 = vpop.f32.mrb[14].mxu1  ;;  %v367_v50 = vadd.f32 %v366_v46, %v3773_v37  ;;  %v368_v51 = vpop.f32.mrb[15].mxu0  ;;  %1704 = vmatmul.mubr.bf16.gmra.mrb[48].mxu1 %v711_v23  ;;  %2043 = vmatmul.mubr.bf16.gmra.mrb[48].mxu0 %v711_v23  ;;  %v651_v62 = vmax.f32 %v363_v31, 0.0  ;;  %v3432_v46 = vld [vmem:[#allocation5 + $0x304] ss:$16 sps:$4 sm:$0xff]  }
 0x128   :  { %v633_v54 = vmax.f32 %v456_v42, 0.0  ;;  %v460_v55 = vadd.f32 %v459_v49, %v3805_v41  ;;  %v461_v56 = vpop.f32.mrb[15].mxu1  ;;  %v369_v57 = vadd.f32 %v368_v51, %v3778_v38  ;;  %1773 = vmatpush1.bf16.msra.mxu1 %v3406_v27  ;;  %2112 = vmatpush1.bf16.msra.mxu0 %v3409_v28  ;;  %v652_v4 = vmax.f32 %v365_v44, 0.0  ;;  %v3427_v44 = vld [vmem:[#allocation5 + $0x2e8] ss:$16 sps:$4 sm:$0xff]  }
 0x129   :  { %v634_v60 = vmax.f32 %v458_v48, 0.0  ;;  %v462_v61 = vadd.f32 %v461_v56, %v3810_v45  ;;  %v656_v63 = vmax.f32 %v367_v50, 0.0  ;;  %1774 = vmatprep.subr.bf16.mxu1 %v3414_v39  ;;  %2113 = vmatprep.subr.bf16.mxu0 %v3417_v40 }
 0x12a   :  { %v638_v3 = vmax.f32 %v460_v55, 0.0  ;;  %v657_v5 = vmax.f32 %v369_v57, 0.0 }
 0x12b   :  { %v639_v6 = vmax.f32 %v462_v61, 0.0  ;;  %v716_v8 = vpack.c.bf16 %v656_v63, %v651_v62  ;;  %v3433_v63 = vld [vmem:[#allocation5 + $0x308] ss:$16 sps:$4 sm:$0xff]  }
 0x12c   :  { %v3836_v9 = vpack.c.bf16 %v638_v3, %v633_v54  ;;  %v717_v10 = vpack.c.bf16 %v657_v5, %v652_v4  ;;  %v372_v11 = vpop.f32.mrb[16].mxu0  ;;  %1775 = vmatpush1.bf16.msra.mxu1 %v3412_v53  ;;  %2114 = vmatpush1.bf16.msra.mxu0 %v3415_v58  ;;  %v3435_v53 = vld [vmem:[#allocation5 + $0x30c] ss:$16 sps:$4 sm:$0xff]  }
 0x12d   :  { %v3838_v15 = vpack.c.bf16 %v639_v6, %v634_v60  ;;  %v465_v16 = vpop.f32.mrb[16].mxu1  ;;  %v373_v17 = vadd.f32 %v372_v11, %v3773_v37  ;;  %v374_v18 = vpop.f32.mrb[17].mxu0  ;;  %1776 = vmatprep.subr.bf16.mxu1 %v3420_v59  ;;  %2115 = vmatprep.subr.bf16.mxu0 %v3423_v1  ;;  %v3430_v59 = vld [vmem:[#allocation5 + $0x300] ss:$16 sps:$4 sm:$0xff]   ;;  %v3438_v1 = vld [vmem:[#allocation5 + $0x324] ss:$16 sps:$4 sm:$0xff]  }
 0x12e   :  { %v466_v22 = vadd.f32 %v465_v16, %v3805_v41  ;;  %v467_v23 = vpop.f32.mrb[17].mxu1  ;;  %v375_v25 = vadd.f32 %v374_v18, %v3778_v38  ;;  %v376_v26 = vpop.f32.mrb[18].mxu0  ;;  %1713 = vmatprep.mubr.bf16.mxu1 %v717_v10  ;;  %2052 = vmatprep.mubr.bf16.mxu0 %v717_v10 }
 0x12f   :  { %v468_v27 = vadd.f32 %v467_v23, %v3810_v45  ;;  %v469_v28 = vpop.f32.mrb[18].mxu1  ;;  %v377_v30 = vadd.f32 %v376_v26, %v3773_v37  ;;  %v378_v31 = vpop.f32.mrb[19].mxu0  ;;  %1714 = vmatmul.mubr.bf16.gmra.mrb[52].mxu1 %v716_v8  ;;  %2053 = vmatmul.mubr.bf16.gmra.mrb[52].mxu0 %v716_v8  ;;  %v661_v50 = vmax.f32 %v373_v17, 0.0  ;;  %v3441_v8 = vld [vmem:[#allocation5 + $0x32c] ss:$16 sps:$4 sm:$0xff]  }
 0x130   :  { %v643_v39 = vmax.f32 %v466_v22, 0.0  ;;  %v470_v40 = vadd.f32 %v469_v28, %v3805_v41  ;;  %v471_v42 = vpop.f32.mrb[19].mxu1  ;;  %v379_v43 = vadd.f32 %v378_v31, %v3778_v38  ;;  %1777 = vmatpush1.bf16.msra.mxu1 %v3418_v12  ;;  %2116 = vmatpush1.bf16.msra.mxu0 %v3421_v13  ;;  %v662_v55 = vmax.f32 %v375_v25, 0.0  ;;  %v3436_v22 = vld [vmem:[#allocation5 + $0x320] ss:$16 sps:$4 sm:$0xff]  }
 0x131   :  { %v644_v48 = vmax.f32 %v468_v27, 0.0  ;;  %v472_v49 = vadd.f32 %v471_v42, %v3810_v45  ;;  %v666_v51 = vmax.f32 %v377_v30, 0.0  ;;  %1778 = vmatprep.subr.bf16.mxu1 %v3426_v20  ;;  %2117 = vmatprep.subr.bf16.mxu0 %v3429_v21  ;;  %v122_v12 = vsub.s32 4, %v3761_v33  ;;  %v3439_v28 = vld [vmem:[#allocation5 + $0x328] ss:$16 sps:$4 sm:$0xff]  }
 0x132   :  { %v648_v54 = vmax.f32 %v470_v40, 0.0  ;;  %v667_v56 = vmax.f32 %v379_v43, 0.0  ;;  %v3444_v30 = vld [vmem:[#allocation5 + $0x344] ss:$16 sps:$4 sm:$0xff]  }
 0x133   :  { %v649_v57 = vmax.f32 %v472_v49, 0.0  ;;  %v721_v58 = vpack.c.bf16 %v666_v51, %v661_v50  ;;  %v3862_v43 = vrot.slane %v3767_v35, %v122_v12  ;;  %v3442_v51 = vld [vmem:[#allocation5 + $0x340] ss:$16 sps:$4 sm:$0xff]  }
 0x134   :  { %v3848_v60 = vpack.c.bf16 %v648_v54, %v643_v39  ;;  %v722_v61 = vpack.c.bf16 %v667_v56, %v662_v55  ;;  %v382_v62 = vpop.f32.mrb[20].mxu0  ;;  %1779 = vmatpush1.bf16.msra.mxu1 %v3424_v32  ;;  %2118 = vmatpush1.bf16.msra.mxu0 %v3427_v44 }
 0x135   :  { %v3850_v3 = vpack.c.bf16 %v649_v57, %v644_v48  ;;  %v475_v4 = vpop.f32.mrb[20].mxu1  ;;  %v383_v5 = vadd.f32 %v382_v62, %v3773_v37  ;;  %v384_v6 = vpop.f32.mrb[21].mxu0  ;;  %1780 = vmatprep.subr.bf16.mxu1 %v3432_v46  ;;  %2119 = vmatprep.subr.bf16.mxu0 %v3435_v53  ;;  %v3445_v53 = vld [vmem:[#allocation5 + $0x348] ss:$16 sps:$4 sm:$0xff]   ;;  %v3450_v57 = vld [vmem:[#allocation5 + $0x364] ss:$16 sps:$4 sm:$0xff]  }
 0x136   :  { %v476_v10 = vadd.f32 %v475_v4, %v3805_v41  ;;  %v477_v11 = vpop.f32.mrb[21].mxu1  ;;  %v385_v13 = vadd.f32 %v384_v6, %v3778_v38  ;;  %v386_v16 = vpop.f32.mrb[22].mxu0  ;;  %1723 = vmatprep.mubr.bf16.mxu1 %v722_v61  ;;  %2062 = vmatprep.mubr.bf16.mxu0 %v722_v61  ;;  %v3453_v62 = vld [vmem:[#allocation5 + $0x36c] ss:$16 sps:$4 sm:$0xff]  }
 0x137   :  { %v478_v17 = vadd.f32 %v477_v11, %v3810_v45  ;;  %v479_v18 = vpop.f32.mrb[22].mxu1  ;;  %v387_v20 = vadd.f32 %v386_v16, %v3773_v37  ;;  %v388_v21 = vpop.f32.mrb[23].mxu0  ;;  %1724 = vmatmul.mubr.bf16.gmra.mrb[56].mxu1 %v721_v58  ;;  %2063 = vmatmul.mubr.bf16.gmra.mrb[56].mxu0 %v721_v58  ;;  %v671_v39 = vmax.f32 %v383_v5, 0.0  ;;  %v3447_v37 = vld [vmem:[#allocation5 + $0x34c] ss:$16 sps:$4 sm:$0xff]  }
 0x138   :  { %v653_v23 = vmax.f32 %v476_v10, 0.0  ;;  %v480_v25 = vadd.f32 %v479_v18, %v3805_v41  ;;  %v481_v26 = vpop.f32.mrb[23].mxu1  ;;  %v389_v27 = vadd.f32 %v388_v21, %v3778_v38  ;;  %1781 = vmatpush1.bf16.msra.mxu1 %v3430_v59  ;;  %2120 = vmatpush1.bf16.msra.mxu0 %v3433_v63  ;;  %v672_v44 = vmax.f32 %v385_v13, 0.0  ;;  %v3448_v16 = vld [vmem:[#allocation5 + $0x360] ss:$16 sps:$4 sm:$0xff]  }
 0x139   :  { %v654_v31 = vmax.f32 %v478_v17, 0.0  ;;  %v482_v32 = vadd.f32 %v481_v26, %v3810_v45  ;;  %v676_v40 = vmax.f32 %v387_v20, 0.0  ;;  %1782 = vmatprep.subr.bf16.mxu1 %v3438_v1  ;;  %2121 = vmatprep.subr.bf16.mxu0 %v3441_v8  ;;  %v3451_v17 = vld [vmem:[#allocation5 + $0x368] ss:$16 sps:$4 sm:$0xff]  }
 0x13a   :  { %v658_v42 = vmax.f32 %v480_v25, 0.0  ;;  %v677_v46 = vmax.f32 %v389_v27, 0.0  ;;  %v3459_v25 = vld [vmem:[#allocation5 + $0x38c] ss:$16 sps:$4 sm:$0xff]  }
 0x13b   :  { %v659_v48 = vmax.f32 %v482_v32, 0.0  ;;  %v726_v38 = vpack.c.bf16 %v676_v40, %v671_v39  ;;  %v3454_v39 = vld [vmem:[#allocation5 + $0x380] ss:$16 sps:$4 sm:$0xff]   ;;  %v3457_v40 = vld [vmem:[#allocation5 + $0x388] ss:$16 sps:$4 sm:$0xff]  }
 0x13c   :  { %v3864_v49 = vpack.c.bf16 %v658_v42, %v653_v23  ;;  %v727_v50 = vpack.c.bf16 %v677_v46, %v672_v44  ;;  %1783 = vmatpush1.bf16.msra.mxu1 %v3436_v22  ;;  %2122 = vmatpush1.bf16.msra.mxu0 %v3439_v28  ;;  %v2973_v56 = vpop.f32.mrb[24].mxu0  ;;  %v3456_v23 = vld [vmem:[#allocation5 + $0x384] ss:$16 sps:$4 sm:$0xff]  }
 0x13d   :  { %v3866_v54 = vpack.c.bf16 %v659_v48, %v654_v31  ;;  %v485_v55 = vpop.f32.mrb[24].mxu1  ;;  %1784 = vmatprep.subr.bf16.mxu1 %v3444_v30  ;;  %2123 = vmatprep.subr.bf16.mxu0 %v3447_v37  ;;  %v567_v59 = vadd.f32 %v2973_v56, %v3862_v43  ;;  %v558_v61 = vpop.f32.mrb[25].mxu0 }
 0x13e   :  { %v486_v35 = vadd.f32 %v485_v55, %v3805_v41  ;;  %v487_v58 = vpop.f32.mrb[25].mxu1  ;;  %1733 = vmatprep.mubr.bf16.mxu1 %v727_v50  ;;  %2072 = vmatprep.mubr.bf16.mxu0 %v727_v50  ;;  %v559_v4 = vadd.f32 %v558_v61, %v3862_v43  ;;  %v2974_v5 = vpop.f32.mrb[26].mxu0 }
 0x13f   :  { %v488_v63 = vadd.f32 %v487_v58, %v3810_v45  ;;  %v489_v1 = vpop.f32.mrb[26].mxu1  ;;  %1734 = vmatmul.mubr.bf16.gmra.mrb[60].mxu1 %v726_v38  ;;  %2073 = vmatmul.mubr.bf16.gmra.mrb[60].mxu0 %v726_v38  ;;  %v635_v11 = vmax.f32 %v567_v59, 0.0  ;;  %v570_v12 = vadd.f32 %v2974_v5, %v3862_v43  ;;  %v561_v13 = vpop.f32.mrb[27].mxu0  ;;  %v3463_v5 = vld [vmem:[#allocation5 + $0x3a8] ss:$16 sps:$4 sm:$0xff]  }
 0x140   :  { %v663_v6 = vmax.f32 %v486_v35, 0.0  ;;  %v490_v8 = vadd.f32 %v489_v1, %v3805_v41  ;;  %v491_v10 = vpop.f32.mrb[27].mxu1  ;;  %1785 = vmatpush1.bf16.msra.mxu1 %v3442_v51  ;;  %2124 = vmatpush1.bf16.msra.mxu0 %v3445_v53  ;;  %v625_v21 = vmax.f32 %v559_v4, 0.0  ;;  %v562_v22 = vadd.f32 %v561_v13, %v3862_v43  ;;  %v3465_v53 = vld [vmem:[#allocation5 + $0x3ac] ss:$16 sps:$4 sm:$0xff]  }
 0x141   :  { %v664_v18 = vmax.f32 %v488_v63, 0.0  ;;  %v492_v20 = vadd.f32 %v491_v10, %v3810_v45  ;;  %1743 = vmatprep.mubr.bf16.mxu1 %v3790_v7  ;;  %1786 = vmatprep.subr.bf16.mxu1 %v3450_v57  ;;  %v640_v27 = vmax.f32 %v570_v12, 0.0  ;;  %v3460_v4 = vld [vmem:[#allocation5 + $0x3a0] ss:$16 sps:$4 sm:$0xff]   ;;  %v3471_v12 = vld [vmem:[#allocation5 + $0x3cc] ss:$16 sps:$4 sm:$0xff]  }
 0x142   :  { %v668_v26 = vmax.f32 %v490_v8, 0.0  ;;  %2082 = vmatprep.mubr.bf16.mxu0 %v3790_v7  ;;  %2125 = vmatprep.subr.bf16.mxu0 %v3453_v62  ;;  %v630_v30 = vmax.f32 %v562_v22, 0.0  ;;  %v3462_v7 = vld [vmem:[#allocation5 + $0x3a4] ss:$16 sps:$4 sm:$0xff]   ;;  %v3466_v22 = vld [vmem:[#allocation5 + $0x3c0] ss:$16 sps:$4 sm:$0xff]  }
 0x143   :  { %v669_v28 = vmax.f32 %v492_v20, 0.0  ;;  %v3880_v32 = vpack.c.bf16 %v640_v27, %v635_v11 }
 0x144   :  { %v3878_v31 = vpack.c.bf16 %v668_v26, %v663_v6  ;;  %1787 = vmatpush1.bf16.msra.mxu1 %v3448_v16  ;;  %2126 = vmatpush1.bf16.msra.mxu0 %v3451_v17  ;;  %v3884_v44 = vpack.c.bf16 %v630_v30, %v625_v21  ;;  %v2977_v46 = vpop.f32.mrb[28].mxu0 }
 0x145   :  { %v3882_v37 = vpack.c.bf16 %v669_v28, %v664_v18  ;;  %v495_v42 = vpop.f32.mrb[28].mxu1  ;;  %1788 = vmatprep.subr.bf16.mxu1 %v3456_v23  ;;  %2127 = vmatprep.subr.bf16.mxu0 %v3459_v25  ;;  %v583_v50 = vadd.f32 %v2977_v46, %v3862_v43  ;;  %v574_v51 = vpop.f32.mrb[29].mxu0  ;;  %v3469_v23 = vld [vmem:[#allocation5 + $0x3c8] ss:$16 sps:$4 sm:$0xff]   ;;  %v3477_v46 = vld [vmem:[#allocation5 + $0x3ec] ss:$16 sps:$4 sm:$0xff]  }
 0x146   :  { %v496_v48 = vadd.f32 %v495_v42, %v3805_v41  ;;  %v497_v38 = vpop.f32.mrb[29].mxu1  ;;  %v575_v57 = vadd.f32 %v574_v51, %v3862_v43  ;;  %v2978_v35 = vpop.f32.mrb[30].mxu0 }
 0x147   :  { %v498_v55 = vadd.f32 %v497_v38, %v3810_v45  ;;  %v499_v56 = vpop.f32.mrb[30].mxu1  ;;  %1744 = vmatmul.mubr.bf16.gmra.mrb[64].mxu1 %v3788_v2  ;;  %2083 = vmatmul.mubr.bf16.gmra.mrb[64].mxu0 %v3788_v2  ;;  %v655_v62 = vmax.f32 %v583_v50, 0.0  ;;  %v586_v63 = vadd.f32 %v2978_v35, %v3862_v43  ;;  %v577_v1 = vpop.f32.mrb[31].mxu0  ;;  %v3468_v2 = vld [vmem:[#allocation5 + $0x3c4] ss:$16 sps:$4 sm:$0xff]  }
 0x148   :  { %v673_v58 = vmax.f32 %v496_v48, 0.0  ;;  %v500_v59 = vadd.f32 %v499_v56, %v3805_v41  ;;  %v501_v61 = vpop.f32.mrb[31].mxu1  ;;  %1789 = vmatpush1.bf16.msra.mxu1 %v3454_v39  ;;  %2128 = vmatpush1.bf16.msra.mxu0 %v3457_v40  ;;  %v645_v10 = vmax.f32 %v575_v57, 0.0  ;;  %v578_v11 = vadd.f32 %v577_v1, %v3862_v43 }
 0x149   :  { %v674_v6 = vmax.f32 %v498_v55, 0.0  ;;  %v502_v8 = vadd.f32 %v501_v61, %v3810_v45  ;;  %1753 = vmatprep.mubr.bf16.mxu1 %v3814_v52  ;;  %1790 = vmatprep.subr.bf16.mxu1 %v3462_v7  ;;  %v660_v16 = vmax.f32 %v586_v63, 0.0 }
 0x14a   :  { %v678_v13 = vmax.f32 %v500_v59, 0.0  ;;  %2092 = vmatprep.mubr.bf16.mxu0 %v3814_v52  ;;  %2129 = vmatprep.subr.bf16.mxu0 %v3465_v53  ;;  %v650_v18 = vmax.f32 %v578_v11, 0.0  ;;  %v3474_v52 = vld [vmem:[#allocation5 + $0x3e4] ss:$16 sps:$4 sm:$0xff]   ;;  %v3475_v59 = vld [vmem:[#allocation5 + $0x3e8] ss:$16 sps:$4 sm:$0xff]  }
 0x14b   :  { %v679_v17 = vmax.f32 %v502_v8, 0.0  ;;  %v3900_v21 = vpack.c.bf16 %v660_v16, %v655_v62 }
 0x14c   :  { %v3898_v20 = vpack.c.bf16 %v678_v13, %v673_v58  ;;  %1791 = vmatpush1.bf16.msra.mxu1 %v3460_v4  ;;  %2130 = vmatpush1.bf16.msra.mxu0 %v3463_v5  ;;  %v3904_v27 = vpack.c.bf16 %v650_v18, %v645_v10  ;;  %v2981_v28 = vpop.f32.mrb[32].mxu0  ;;  %v3472_v58 = vld [vmem:[#allocation5 + $0x3e0] ss:$16 sps:$4 sm:$0xff]   ;;  %v3483_v4 = vld [vmem:[#allocation5 + $0x40c] ss:$16 sps:$4 sm:$0xff]  }
 0x14d   :  { %v3902_v25 = vpack.c.bf16 %v679_v17, %v674_v6  ;;  %v505_v26 = vpop.f32.mrb[32].mxu1  ;;  %1792 = vmatprep.subr.bf16.mxu1 %v3468_v2  ;;  %2131 = vmatprep.subr.bf16.mxu0 %v3471_v12  ;;  %v599_v40 = vadd.f32 %v2981_v28, %v3862_v43  ;;  %v590_v42 = vpop.f32.mrb[33].mxu0  ;;  %v3478_v12 = vld [vmem:[#allocation5 + $0x400] ss:$16 sps:$4 sm:$0xff]   ;;  %v3481_v13 = vld [vmem:[#allocation5 + $0x408] ss:$16 sps:$4 sm:$0xff]  }
 0x14e   :  { %v506_v30 = vadd.f32 %v505_v26, %v3805_v41  ;;  %v507_v39 = vpop.f32.mrb[33].mxu1  ;;  %v591_v38 = vadd.f32 %v590_v42, %v3862_v43  ;;  %v2982_v50 = vpop.f32.mrb[34].mxu0 }
 0x14f   :  { %v508_v7 = vadd.f32 %v507_v39, %v3810_v45  ;;  %v509_v48 = vpop.f32.mrb[34].mxu1  ;;  %1754 = vmatmul.mubr.bf16.gmra.mrb[68].mxu1 %v3812_v47  ;;  %2093 = vmatmul.mubr.bf16.gmra.mrb[68].mxu0 %v3812_v47  ;;  %v675_v56 = vmax.f32 %v599_v40, 0.0  ;;  %v602_v57 = vadd.f32 %v2982_v50, %v3862_v43  ;;  %v593_v35 = vpop.f32.mrb[35].mxu0  ;;  %v3480_v47 = vld [vmem:[#allocation5 + $0x404] ss:$16 sps:$4 sm:$0xff]  }
 0x150   :  { %v683_v51 = vmax.f32 %v506_v30, 0.0  ;;  %v510_v53 = vadd.f32 %v509_v48, %v3805_v41  ;;  %v511_v55 = vpop.f32.mrb[35].mxu1  ;;  %1793 = vmatpush1.bf16.msra.mxu1 %v3466_v22  ;;  %2132 = vmatpush1.bf16.msra.mxu0 %v3469_v23  ;;  %v665_v63 = vmax.f32 %v591_v38, 0.0  ;;  %v594_v1 = vadd.f32 %v593_v35, %v3862_v43  ;;  %v3489_v30 = vld [vmem:[#allocation5 + $0x42c] ss:$16 sps:$4 sm:$0xff]  }
 0x151   :  { %v684_v61 = vmax.f32 %v508_v7, 0.0  ;;  %v512_v62 = vadd.f32 %v511_v55, %v3810_v45  ;;  %1794 = vmatprep.subr.bf16.mxu1 %v3474_v52  ;;  %1796 = vmatprep.mubr.bf16.mxu1 %v3826_v29  ;;  %v680_v6 = vmax.f32 %v602_v57, 0.0  ;;  %v3486_v52 = vld [vmem:[#allocation5 + $0x424] ss:$16 sps:$4 sm:$0xff]   ;;  %v3484_v55 = vld [vmem:[#allocation5 + $0x420] ss:$16 sps:$4 sm:$0xff]  }
 0x152   :  { %v688_v5 = vmax.f32 %v510_v53, 0.0  ;;  %2133 = vmatprep.subr.bf16.mxu0 %v3477_v46  ;;  %2135 = vmatprep.mubr.bf16.mxu0 %v3826_v29  ;;  %v670_v10 = vmax.f32 %v594_v1, 0.0 }
 0x153   :  { %v689_v8 = vmax.f32 %v512_v62, 0.0  ;;  %v3920_v2 = vpack.c.bf16 %v680_v6, %v675_v56  ;;  %v3487_v56 = vld [vmem:[#allocation5 + $0x428] ss:$16 sps:$4 sm:$0xff]  }
 0x154   :  { %v3918_v11 = vpack.c.bf16 %v688_v5, %v683_v51  ;;  %1795 = vmatpush1.bf16.msra.mxu1 %v3472_v58  ;;  %2134 = vmatpush1.bf16.msra.mxu0 %v3475_v59  ;;  %v3924_v18 = vpack.c.bf16 %v670_v10, %v665_v63  ;;  %v2985_v22 = vpop.f32.mrb[36].mxu0  ;;  %v3493_v6 = vld [vmem:[#allocation5 + $0x448] ss:$16 sps:$4 sm:$0xff]   ;;  %v3496_v10 = vld [vmem:[#allocation5 + $0x460] ss:$16 sps:$4 sm:$0xff]  }
 0x155   :  { %v3922_v16 = vpack.c.bf16 %v689_v8, %v684_v61  ;;  %v515_v17 = vpop.f32.mrb[36].mxu1  ;;  %1877 = vmatprep.subr.bf16.mxu1 %v3480_v47  ;;  %2216 = vmatprep.subr.bf16.mxu0 %v3483_v4  ;;  %v615_v26 = vadd.f32 %v2985_v22, %v3862_v43  ;;  %v606_v28 = vpop.f32.mrb[37].mxu0  ;;  %v3501_v8 = vld [vmem:[#allocation5 + $0x46c] ss:$16 sps:$4 sm:$0xff]  }
 0x156   :  { %v516_v29 = vadd.f32 %v515_v17, %v3805_v41  ;;  %v517_v23 = vpop.f32.mrb[37].mxu1  ;;  %v607_v42 = vadd.f32 %v606_v28, %v3862_v43  ;;  %v2986_v46 = vpop.f32.mrb[38].mxu0 }
 0x157   :  { %v518_v39 = vadd.f32 %v517_v23, %v3810_v45  ;;  %v519_v40 = vpop.f32.mrb[38].mxu1  ;;  %1797 = vmatmul.mubr.bf16.vlgmr.msra.gmra.mrb[40].mxu1 %v3824_v24  ;;  %2136 = vmatmul.mubr.bf16.vlgmr.msra.gmra.mrb[40].mxu0 %v3824_v24  ;;  %v695_v50 = vmax.f32 %v615_v26, 0.0  ;;  %v618_v51 = vadd.f32 %v2986_v46, %v3862_v43  ;;  %v609_v53 = vpop.f32.mrb[39].mxu0  ;;  %v3495_v24 = vld [vmem:[#allocation5 + $0x44c] ss:$16 sps:$4 sm:$0xff]  }
 0x158   :  { %v693_v7 = vmax.f32 %v516_v29, 0.0  ;;  %v520_v48 = vadd.f32 %v519_v40, %v3805_v41  ;;  %v521_v38 = vpop.f32.mrb[39].mxu1  ;;  %1878 = vmatpush1.bf16.msra.mxu1 %v3478_v12  ;;  %2217 = vmatpush1.bf16.msra.mxu0 %v3481_v13  ;;  %v685_v58 = vmax.f32 %v607_v42, 0.0  ;;  %v610_v59 = vadd.f32 %v609_v53, %v3862_v43  ;;  %v3492_v41 = vld [vmem:[#allocation5 + $0x444] ss:$16 sps:$4 sm:$0xff]  }
 0x159   :  { %v694_v57 = vmax.f32 %v518_v39, 0.0  ;;  %v522_v35 = vadd.f32 %v521_v38, %v3810_v45  ;;  %1806 = vmatprep.mubr.bf16.mxu1 %v3838_v15  ;;  %2145 = vmatprep.mubr.bf16.mxu0 %v3838_v15  ;;  %v700_v62 = vmax.f32 %v618_v51, 0.0  ;;  %v3490_v43 = vld [vmem:[#allocation5 + $0x440] ss:$16 sps:$4 sm:$0xff]   ;;  %v3498_v15 = vld [vmem:[#allocation5 + $0x464] ss:$16 sps:$4 sm:$0xff]  }
 0x15a   :  { %v698_v61 = vmax.f32 %v520_v48, 0.0  ;;  %1879 = vmatprep.subr.bf16.mxu1 %v3486_v52  ;;  %2218 = vmatprep.subr.bf16.mxu0 %v3489_v30  ;;  %v690_v1 = vmax.f32 %v610_v59, 0.0  ;;  %v3499_v12 = vld [vmem:[#allocation5 + $0x468] ss:$16 sps:$4 sm:$0xff]   ;;  %v3502_v13 = vld [vmem:[%s4154_s5] sm:$0xff]  }
 0x15b   :  { %v699_v63 = vmax.f32 %v522_v35, 0.0  ;;  %v3938_v4 = vpack.c.bf16 %v700_v62, %v695_v50 }
 0x15c   :  { %v738_v47 = vpack.c.bf16 %v698_v61, %v693_v7  ;;  %1880 = vmatpush1.bf16.msra.mxu1 %v3484_v55  ;;  %2219 = vmatpush1.bf16.msra.mxu0 %v3487_v56  ;;  %v3940_v5 = vpack.c.bf16 %v690_v1, %v685_v58 }
 0x15d   :  { %v739_v45 = vpack.c.bf16 %v699_v63, %v694_v57  ;;  %1881 = vmatprep.subr.bf16.mxu1 %v3492_v41  ;;  %2220 = vmatprep.subr.bf16.mxu0 %v3495_v24 }
 0x15f   :  { %1807 = vmatmul.mubr.bf16.gmra.mrb[44].mxu1 %v3836_v9  ;;  %2146 = vmatmul.mubr.bf16.gmra.mrb[44].mxu0 %v3836_v9  ;;  %v3503_v9 = vld [vmem:[%s4154_s5 + $0x8] sm:$0xff]  }
 0x160   :  { %1816 = vmatprep.mubr.bf16.mxu1 %v3850_v3  ;;  %2155 = vmatprep.mubr.bf16.mxu0 %v3850_v3  ;;  %v3505_v3 = vld [vmem:[%s4154_s5 + $0x18] sm:$0xff]  }
 0x161   :  { %1882 = vmatpush1.bf16.msra.mxu1 %v3490_v43  ;;  %2221 = vmatpush1.bf16.msra.mxu0 %v3493_v6 }
 0x162   :  { %1883 = vmatprep.subr.bf16.mxu1 %v3498_v15  ;;  %2222 = vmatprep.subr.bf16.mxu0 %v3501_v8 }
 0x165   :  { %1884 = vmatpush1.bf16.msra.mxu1 %v3496_v10  ;;  %2223 = vmatpush1.bf16.msra.mxu0 %v3499_v12 }
 0x166   :  { %2987 = vmatprep.subr.bf16.mxu1 %v3502_v13 }
 0x167   :  { %1817 = vmatmul.mubr.bf16.gmra.mrb[48].mxu1 %v3848_v60  ;;  %2156 = vmatmul.mubr.bf16.gmra.mrb[48].mxu0 %v3848_v60  ;;  %v3504_v60 = vld [vmem:[%s4154_s5 + $0x10] sm:$0xff]  }
 0x168   :  { %1826 = vmatprep.mubr.bf16.mxu1 %v3866_v54  ;;  %2165 = vmatprep.mubr.bf16.mxu0 %v3866_v54  ;;  %v3507_v54 = vld [vmem:[%s4154_s5 + $0x28] sm:$0xff]  }
 0x16f   :  { %1827 = vmatmul.mubr.bf16.gmra.mrb[52].mxu1 %v3864_v49  ;;  %2166 = vmatmul.mubr.bf16.gmra.mrb[52].mxu0 %v3864_v49  ;;  %v3506_v49 = vld [vmem:[%s4154_s5 + $0x20] sm:$0xff]  }
 0x170   :  { %1836 = vmatprep.mubr.bf16.mxu1 %v3882_v37  ;;  %2175 = vmatprep.mubr.bf16.mxu0 %v3882_v37 }
 0x177   :  { %1837 = vmatmul.mubr.bf16.gmra.mrb[56].mxu1 %v3878_v31  ;;  %2176 = vmatmul.mubr.bf16.gmra.mrb[56].mxu0 %v3878_v31  ;;  %v3508_v31 = vld [vmem:[%s4154_s5 + $0x30] sm:$0xff]  }
 0x178   :  { %1846 = vmatprep.mubr.bf16.mxu1 %v3902_v25  ;;  %2185 = vmatprep.mubr.bf16.mxu0 %v3902_v25 }
 0x17f   :  { %1847 = vmatmul.mubr.bf16.gmra.mrb[60].mxu1 %v3898_v20  ;;  %2186 = vmatmul.mubr.bf16.gmra.mrb[60].mxu0 %v3898_v20 }
 0x180   :  { %1856 = vmatprep.mubr.bf16.mxu1 %v3922_v16  ;;  %2195 = vmatprep.mubr.bf16.mxu0 %v3922_v16 }
 0x187   :  { %1857 = vmatmul.mubr.bf16.gmra.mrb[64].mxu1 %v3918_v11  ;;  %2196 = vmatmul.mubr.bf16.gmra.mrb[64].mxu0 %v3918_v11 }
 0x188   :  { %1866 = vmatprep.mubr.bf16.mxu1 %v739_v45  ;;  %2205 = vmatprep.mubr.bf16.mxu0 %v739_v45 }
 0x18f   :  { %1867 = vmatmul.mubr.bf16.gmra.mrb[68].mxu1 %v738_v47  ;;  %2206 = vmatmul.mubr.bf16.gmra.mrb[68].mxu0 %v738_v47 }
 0x190   :  { %1909 = vmatprep.mubr.bf16.mxu1 %v3588_v0  ;;  %2248 = vmatprep.mubr.bf16.mxu0 %v3588_v0 }
 0x197   :  { %2901 = vmatmul.mubr.msk.bf16.vlgmr.msra.gmra.mrb[40].mxu1 %vm273_vm0, %v3884_v44  ;;  %2909 = vmatmul.mubr.msk.bf16.vlgmr.msra.gmra.mrb[40].mxu0 %vm273_vm0, %v3884_v44 }
 0x198   :  { %1919 = vmatprep.mubr.bf16.mxu1 %v3588_v0  ;;  %2258 = vmatprep.mubr.bf16.mxu0 %v3588_v0 }
 0x199   :  { %2988 = vmatpush3.bf16.msra.mxu1 %v3502_v13 }
 0x19a   :  { %2989 = vmatprep.subr.bf16.mxu1 %v3503_v9 }
 0x19d   :  { %2990 = vmatpush3.bf16.msra.mxu1 %v3503_v9 }
 0x19e   :  { %2991 = vmatprep.subr.bf16.mxu1 %v3504_v60 }
 0x19f   :  { %2902 = vmatmul.mubr.msk.bf16.gmra.mrb[44].mxu1 %vm273_vm0, %v3880_v32  ;;  %2910 = vmatmul.mubr.msk.bf16.gmra.mrb[44].mxu0 %vm273_vm0, %v3880_v32  ;;  %v3509_v32 = vld [vmem:[%s4154_s5 + $0x38] sm:$0xff]  }
 0x1a0   :  { %1929 = vmatprep.mubr.bf16.mxu1 %v3588_v0  ;;  %2268 = vmatprep.mubr.bf16.mxu0 %v3588_v0 }
 0x1a1   :  { %2992 = vmatpush3.bf16.msra.mxu1 %v3504_v60 }
 0x1a2   :  { %2993 = vmatprep.subr.bf16.mxu1 %v3505_v3 }
 0x1a5   :  { %2994 = vmatpush3.bf16.msra.mxu1 %v3505_v3 }
 0x1a6   :  { %2995 = vmatprep.subr.bf16.mxu1 %v3506_v49 }
 0x1a7   :  { %2903 = vmatmul.mubr.msk.bf16.gmra.mrb[48].mxu1 %vm273_vm0, %v3904_v27  ;;  %2911 = vmatmul.mubr.msk.bf16.gmra.mrb[48].mxu0 %vm273_vm0, %v3904_v27 }
 0x1a8   :  { %1939 = vmatprep.mubr.bf16.mxu1 %v3588_v0  ;;  %2278 = vmatprep.mubr.bf16.mxu0 %v3588_v0 }
 0x1a9   :  { %2996 = vmatpush3.bf16.msra.mxu1 %v3506_v49 }
 0x1aa   :  { %2997 = vmatprep.subr.bf16.mxu1 %v3507_v54 }
 0x1ad   :  { %2998 = vmatpush3.bf16.msra.mxu1 %v3507_v54 }
 0x1ae   :  { %2999 = vmatprep.subr.bf16.mxu1 %v3508_v31 }
 0x1af   :  { %2904 = vmatmul.mubr.msk.bf16.gmra.mrb[52].mxu1 %vm273_vm0, %v3900_v21  ;;  %2912 = vmatmul.mubr.msk.bf16.gmra.mrb[52].mxu0 %vm273_vm0, %v3900_v21 }
 0x1b0   :  { %1949 = vmatprep.mubr.bf16.mxu1 %v3588_v0  ;;  %2288 = vmatprep.mubr.bf16.mxu0 %v3588_v0 }
 0x1b1   :  { %3000 = vmatpush3.bf16.msra.mxu1 %v3508_v31 }
 0x1b2   :  { %3001 = vmatprep.subr.bf16.mxu1 %v3509_v32 }
 0x1b5   :  { %3002 = vmatpush3.bf16.msra.mxu1 %v3509_v32 }
 0x1b7   :  { %2905 = vmatmul.mubr.msk.bf16.gmra.mrb[56].mxu1 %vm273_vm0, %v3924_v18  ;;  %2913 = vmatmul.mubr.msk.bf16.gmra.mrb[56].mxu0 %vm273_vm0, %v3924_v18 }
 0x1b8   :  { %1959 = vmatprep.mubr.bf16.mxu1 %v3588_v0  ;;  %2298 = vmatprep.mubr.bf16.mxu0 %v3588_v0 }
 0x1bf   :  { %2906 = vmatmul.mubr.msk.bf16.gmra.mrb[60].mxu1 %vm273_vm0, %v3920_v2  ;;  %2914 = vmatmul.mubr.msk.bf16.gmra.mrb[60].mxu0 %vm273_vm0, %v3920_v2 }
 0x1c0   :  { %1969 = vmatprep.mubr.bf16.mxu1 %v3588_v0  ;;  %2308 = vmatprep.mubr.bf16.mxu0 %v3588_v0 }
 0x1c7   :  { %2907 = vmatmul.mubr.msk.bf16.gmra.mrb[64].mxu1 %vm273_vm0, %v3940_v5  ;;  %2915 = vmatmul.mubr.msk.bf16.gmra.mrb[64].mxu0 %vm273_vm0, %v3940_v5 }
 0x1c8   :  { %1979 = vmatprep.mubr.bf16.mxu1 %v3588_v0  ;;  %2318 = vmatprep.mubr.bf16.mxu0 %v3588_v0  ;;  %v885_v0 = vld [vmem:[%s4153_s4] sm:$0xf] }
 0x1c9   :  { %v4041_v37 = vrot.slane %v885_v0, %v106_v34  ;;  %v4045_v44 = vrot.slane %v885_v0, %v114_v14  ;;  %v4049_v20 = vrot.slane %v885_v0, %v110_v36  ;;  %v4053_v21 = vrot.slane %v885_v0, %v118_v19 }
 0x1cf   :  { %2908 = vmatmul.mubr.msk.bf16.gmra.mrb[68].mxu1 %vm273_vm0, %v3938_v4  ;;  %2916 = vmatmul.mubr.msk.bf16.gmra.mrb[68].mxu0 %vm273_vm0, %v3938_v4 }
 0x26a   :  { %v1911_v25 = vpop.f32.mrb[40].mxu1  ;;  %v2250_v27 = vpop.f32.mrb[40].mxu0 }
 0x26b   :  { %v3047_v11 = vadd.f32 %v1911_v25, %v4041_v37  ;;  %v3079_v2 = vadd.f32 %v2250_v27, %v4045_v44  ;;  %v1913_v34 = vpop.f32.mrb[41].mxu1  ;;  %v2252_v16 = vpop.f32.mrb[41].mxu0 }
 0x26c   :  { %v3048_v17 = vadd.f32 %v1913_v34, %v4049_v20  ;;  %v3080_v14 = vadd.f32 %v2252_v16, %v4053_v21  ;;  %v1915_v18 = vpop.f32.mrb[42].mxu1  ;;  %v2254_v22 = vpop.f32.mrb[42].mxu0 }
 0x26d   :  { %v2329_v36 = vmax.f32 %v3047_v11, 0.0  ;;  %v2331_v29 = vmax.f32 %v3079_v2, 0.0  ;;  %v3049_v33 = vadd.f32 %v1915_v18, %v4041_v37  ;;  %v3081_v19 = vadd.f32 %v2254_v22, %v4045_v44  ;;  %v1917_v23 = vpop.f32.mrb[43].mxu1  ;;  %v2256_v26 = vpop.f32.mrb[43].mxu0 }
 0x26e   :  { %v2330_v28 = vmax.f32 %v3048_v17, 0.0  ;;  %v2332_v52 = vmax.f32 %v3080_v14, 0.0  ;;  %v3050_v30 = vadd.f32 %v1917_v23, %v4049_v20  ;;  %v3082_v39 = vadd.f32 %v2256_v26, %v4053_v21 }
 0x26f   :  { %v2333_v40 = vmax.f32 %v3049_v33, 0.0  ;;  %v2335_v42 = vmax.f32 %v3081_v19, 0.0 }
 0x270   :  { %v2393_v46 = vmax.f32 %v2329_v36, %v2330_v28  ;;  %v2409_v7 = vmax.f32 %v2331_v29, %v2332_v52  ;;  %v2334_v48 = vmax.f32 %v3050_v30, 0.0  ;;  %v2336_v38 = vmax.f32 %v3082_v39, 0.0 }
 0x272   :  { %v2425_v50 = vmax.f32 %v2393_v46, %v2409_v7  ;;  %v2394_v51 = vmax.f32 %v2333_v40, %v2334_v48  ;;  %v2410_v53 = vmax.f32 %v2335_v42, %v2336_v38  ;;  %v1921_v55 = vpop.f32.mrb[44].mxu1  ;;  %v2260_v56 = vpop.f32.mrb[44].mxu0 }
 0x273   :  { %v3051_v57 = vadd.f32 %v1921_v55, %v4041_v37  ;;  %v3083_v35 = vadd.f32 %v2260_v56, %v4045_v44  ;;  %v1923_v58 = vpop.f32.mrb[45].mxu1  ;;  %v2262_v59 = vpop.f32.mrb[45].mxu0 }
 0x274   :  { %v2426_v41 = vmax.f32 %v2394_v51, %v2410_v53  ;;  %v3052_v24 = vadd.f32 %v1923_v58, %v4049_v20  ;;  %v3084_v61 = vadd.f32 %v2262_v59, %v4053_v21  ;;  %v1925_v62 = vpop.f32.mrb[46].mxu1  ;;  %v2264_v63 = vpop.f32.mrb[46].mxu0 }
 0x275   :  { %v2337_v1 = vmax.f32 %v3051_v57, 0.0  ;;  %v2339_v47 = vmax.f32 %v3083_v35, 0.0  ;;  %v3053_v4 = vadd.f32 %v1925_v62, %v4041_v37  ;;  %v3085_v45 = vadd.f32 %v2264_v63, %v4045_v44  ;;  %v1927_v5 = vpop.f32.mrb[47].mxu1  ;;  %v2266_v43 = vpop.f32.mrb[47].mxu0 }
 0x276   :  { %v2338_v6 = vmax.f32 %v3052_v24, 0.0  ;;  %v2340_v15 = vmax.f32 %v3084_v61, 0.0  ;;  %v3054_v8 = vadd.f32 %v1927_v5, %v4049_v20  ;;  %v3086_v10 = vadd.f32 %v2266_v43, %v4053_v21 }
 0x277   :  { %v2341_v12 = vmax.f32 %v3053_v4, 0.0  ;;  %v2343_v13 = vmax.f32 %v3085_v45, 0.0  ;;  %v2441_v9 = vpack.c.bf16 %v2426_v41, %v2425_v50 }
 0x278   :  { %v2395_v60 = vmax.f32 %v2337_v1, %v2338_v6  ;;  %v2411_v3 = vmax.f32 %v2339_v47, %v2340_v15  ;;  %v2342_v49 = vmax.f32 %v3054_v8, 0.0  ;;  %v2344_v54 = vmax.f32 %v3086_v10, 0.0 }
 0x279   :  { %3003 = vmatprep.mubr.bf16.mxu1 %v2441_v9 }
 0x27a   :  { %v2427_v31 = vmax.f32 %v2395_v60, %v2411_v3  ;;  %v2396_v32 = vmax.f32 %v2341_v12, %v2342_v49  ;;  %v2412_v0 = vmax.f32 %v2343_v13, %v2344_v54  ;;  %v1931_v25 = vpop.f32.mrb[48].mxu1  ;;  %v2270_v27 = vpop.f32.mrb[48].mxu0 }
 0x27b   :  { %v3055_v11 = vadd.f32 %v1931_v25, %v4041_v37  ;;  %v3087_v2 = vadd.f32 %v2270_v27, %v4045_v44  ;;  %v1933_v34 = vpop.f32.mrb[49].mxu1  ;;  %v2272_v16 = vpop.f32.mrb[49].mxu0 }
 0x27c   :  { %v2428_v17 = vmax.f32 %v2396_v32, %v2412_v0  ;;  %v3056_v14 = vadd.f32 %v1933_v34, %v4049_v20  ;;  %v3088_v18 = vadd.f32 %v2272_v16, %v4053_v21  ;;  %v1935_v22 = vpop.f32.mrb[50].mxu1  ;;  %v2274_v36 = vpop.f32.mrb[50].mxu0 }
 0x27d   :  { %v2345_v29 = vmax.f32 %v3055_v11, 0.0  ;;  %v2347_v33 = vmax.f32 %v3087_v2, 0.0  ;;  %v3057_v19 = vadd.f32 %v1935_v22, %v4041_v37  ;;  %v3089_v23 = vadd.f32 %v2274_v36, %v4045_v44  ;;  %v1937_v26 = vpop.f32.mrb[51].mxu1  ;;  %v2276_v28 = vpop.f32.mrb[51].mxu0 }
 0x27e   :  { %v2442_v52 = vpack.c.bf16 %v2428_v17, %v2427_v31  ;;  %v2346_v30 = vmax.f32 %v3056_v14, 0.0  ;;  %v2348_v39 = vmax.f32 %v3088_v18, 0.0  ;;  %v3058_v40 = vadd.f32 %v1937_v26, %v4049_v20 }
 0x27f   :  { %v2349_v42 = vmax.f32 %v3057_v19, 0.0  ;;  %v2351_v46 = vmax.f32 %v3089_v23, 0.0  ;;  %v3090_v7 = vadd.f32 %v2276_v28, %v4053_v21 }
 0x280   :  { %v2397_v48 = vmax.f32 %v2345_v29, %v2346_v30  ;;  %v2413_v38 = vmax.f32 %v2347_v33, %v2348_v39  ;;  %v2350_v50 = vmax.f32 %v3058_v40, 0.0  ;;  %3004 = vmatmul.mubr.bf16.vlgmr.msra.gmra.mrb[72].mxu1 %v2442_v52 }
 0x281   :  { %v2352_v51 = vmax.f32 %v3090_v7, 0.0 }
 0x282   :  { %v2429_v53 = vmax.f32 %v2397_v48, %v2413_v38  ;;  %v2398_v55 = vmax.f32 %v2349_v42, %v2350_v50  ;;  %v1941_v56 = vpop.f32.mrb[52].mxu1  ;;  %v2280_v57 = vpop.f32.mrb[52].mxu0 }
 0x283   :  { %v2414_v35 = vmax.f32 %v2351_v46, %v2352_v51  ;;  %v3059_v58 = vadd.f32 %v1941_v56, %v4041_v37  ;;  %v3091_v59 = vadd.f32 %v2280_v57, %v4045_v44  ;;  %v1943_v41 = vpop.f32.mrb[53].mxu1  ;;  %v2282_v24 = vpop.f32.mrb[53].mxu0 }
 0x284   :  { %v3060_v61 = vadd.f32 %v1943_v41, %v4049_v20  ;;  %v3092_v62 = vadd.f32 %v2282_v24, %v4053_v21  ;;  %v1945_v63 = vpop.f32.mrb[54].mxu1  ;;  %v2284_v1 = vpop.f32.mrb[54].mxu0 }
 0x285   :  { %v2430_v47 = vmax.f32 %v2398_v55, %v2414_v35  ;;  %v2353_v4 = vmax.f32 %v3059_v58, 0.0  ;;  %v2355_v45 = vmax.f32 %v3091_v59, 0.0  ;;  %v3061_v5 = vadd.f32 %v1945_v63, %v4041_v37  ;;  %v1947_v43 = vpop.f32.mrb[55].mxu1  ;;  %v2286_v6 = vpop.f32.mrb[55].mxu0 }
 0x286   :  { %v2354_v15 = vmax.f32 %v3060_v61, 0.0  ;;  %v2356_v8 = vmax.f32 %v3092_v62, 0.0  ;;  %v3093_v10 = vadd.f32 %v2284_v1, %v4045_v44  ;;  %v3062_v12 = vadd.f32 %v1947_v43, %v4049_v20 }
 0x287   :  { %v2357_v13 = vmax.f32 %v3061_v5, 0.0  ;;  %v3094_v9 = vadd.f32 %v2286_v6, %v4053_v21  ;;  %v2443_v60 = vpack.c.bf16 %v2430_v47, %v2429_v53 }
 0x288   :  { %v2399_v3 = vmax.f32 %v2353_v4, %v2354_v15  ;;  %v2415_v49 = vmax.f32 %v2355_v45, %v2356_v8  ;;  %v2359_v54 = vmax.f32 %v3093_v10, 0.0  ;;  %v2358_v31 = vmax.f32 %v3062_v12, 0.0 }
 0x289   :  { %v2360_v32 = vmax.f32 %v3094_v9, 0.0  ;;  %3007 = vmatprep.mubr.bf16.mxu1 %v2443_v60 }
 0x28a   :  { %v2431_v0 = vmax.f32 %v2399_v3, %v2415_v49  ;;  %v2400_v25 = vmax.f32 %v2357_v13, %v2358_v31  ;;  %v1951_v27 = vpop.f32.mrb[56].mxu1  ;;  %v2290_v11 = vpop.f32.mrb[56].mxu0 }
 0x28b   :  { %v2416_v2 = vmax.f32 %v2359_v54, %v2360_v32  ;;  %v3063_v34 = vadd.f32 %v1951_v27, %v4041_v37  ;;  %v3095_v16 = vadd.f32 %v2290_v11, %v4045_v44  ;;  %v1953_v17 = vpop.f32.mrb[57].mxu1  ;;  %v2292_v14 = vpop.f32.mrb[57].mxu0 }
 0x28c   :  { %v3064_v18 = vadd.f32 %v1953_v17, %v4049_v20  ;;  %v3096_v22 = vadd.f32 %v2292_v14, %v4053_v21  ;;  %v1955_v36 = vpop.f32.mrb[58].mxu1  ;;  %v2294_v29 = vpop.f32.mrb[58].mxu0 }
 0x28d   :  { %v2432_v33 = vmax.f32 %v2400_v25, %v2416_v2  ;;  %v2361_v19 = vmax.f32 %v3063_v34, 0.0  ;;  %v2363_v23 = vmax.f32 %v3095_v16, 0.0  ;;  %v3065_v26 = vadd.f32 %v1955_v36, %v4041_v37  ;;  %v1957_v28 = vpop.f32.mrb[59].mxu1  ;;  %v2296_v52 = vpop.f32.mrb[59].mxu0 }
 0x28e   :  { %v2362_v30 = vmax.f32 %v3064_v18, 0.0  ;;  %v2364_v39 = vmax.f32 %v3096_v22, 0.0  ;;  %v3097_v40 = vadd.f32 %v2294_v29, %v4045_v44  ;;  %v3066_v42 = vadd.f32 %v1957_v28, %v4049_v20 }
 0x28f   :  { %v2365_v46 = vmax.f32 %v3065_v26, 0.0  ;;  %v3098_v7 = vadd.f32 %v2296_v52, %v4053_v21  ;;  %v2444_v48 = vpack.c.bf16 %v2432_v33, %v2431_v0 }
 0x290   :  { %v2401_v38 = vmax.f32 %v2361_v19, %v2362_v30  ;;  %v2417_v50 = vmax.f32 %v2363_v23, %v2364_v39  ;;  %v2367_v51 = vmax.f32 %v3097_v40, 0.0  ;;  %v2366_v53 = vmax.f32 %v3066_v42, 0.0 }
 0x291   :  { %v2368_v55 = vmax.f32 %v3098_v7, 0.0  ;;  %3008 = vmatmul.mubr.bf16.gmra.mrb[76].mxu1 %v2444_v48 }
 0x292   :  { %v2433_v56 = vmax.f32 %v2401_v38, %v2417_v50  ;;  %v2402_v57 = vmax.f32 %v2365_v46, %v2366_v53  ;;  %v1961_v35 = vpop.f32.mrb[60].mxu1  ;;  %v2300_v58 = vpop.f32.mrb[60].mxu0 }
 0x293   :  { %v2418_v59 = vmax.f32 %v2367_v51, %v2368_v55  ;;  %v3067_v41 = vadd.f32 %v1961_v35, %v4041_v37  ;;  %v3099_v24 = vadd.f32 %v2300_v58, %v4045_v44  ;;  %v1963_v61 = vpop.f32.mrb[61].mxu1  ;;  %v2302_v62 = vpop.f32.mrb[61].mxu0 }
 0x294   :  { %v3068_v63 = vadd.f32 %v1963_v61, %v4049_v20  ;;  %v3100_v1 = vadd.f32 %v2302_v62, %v4053_v21  ;;  %v1965_v47 = vpop.f32.mrb[62].mxu1  ;;  %v2304_v4 = vpop.f32.mrb[62].mxu0 }
 0x295   :  { %v2434_v45 = vmax.f32 %v2402_v57, %v2418_v59  ;;  %v2369_v5 = vmax.f32 %v3067_v41, 0.0  ;;  %v2371_v43 = vmax.f32 %v3099_v24, 0.0  ;;  %v3069_v6 = vadd.f32 %v1965_v47, %v4041_v37  ;;  %v1967_v15 = vpop.f32.mrb[63].mxu1  ;;  %v2306_v8 = vpop.f32.mrb[63].mxu0 }
 0x296   :  { %v2370_v10 = vmax.f32 %v3068_v63, 0.0  ;;  %v2372_v12 = vmax.f32 %v3100_v1, 0.0  ;;  %v3101_v13 = vadd.f32 %v2304_v4, %v4045_v44  ;;  %v3070_v9 = vadd.f32 %v1967_v15, %v4049_v20 }
 0x297   :  { %v2373_v60 = vmax.f32 %v3069_v6, 0.0  ;;  %v3102_v3 = vadd.f32 %v2306_v8, %v4053_v21  ;;  %v2445_v49 = vpack.c.bf16 %v2434_v45, %v2433_v56 }
 0x298   :  { %v2403_v54 = vmax.f32 %v2369_v5, %v2370_v10  ;;  %v2419_v31 = vmax.f32 %v2371_v43, %v2372_v12  ;;  %v2375_v32 = vmax.f32 %v3101_v13, 0.0  ;;  %v2374_v0 = vmax.f32 %v3070_v9, 0.0 }
 0x299   :  { %v2376_v25 = vmax.f32 %v3102_v3, 0.0  ;;  %3011 = vmatprep.mubr.bf16.mxu1 %v2445_v49 }
 0x29a   :  { %v2435_v27 = vmax.f32 %v2403_v54, %v2419_v31  ;;  %v2404_v11 = vmax.f32 %v2373_v60, %v2374_v0  ;;  %v1971_v2 = vpop.f32.mrb[64].mxu1  ;;  %v2310_v34 = vpop.f32.mrb[64].mxu0 }
 0x29b   :  { %v2420_v16 = vmax.f32 %v2375_v32, %v2376_v25  ;;  %v3071_v17 = vadd.f32 %v1971_v2, %v4041_v37  ;;  %v3103_v14 = vadd.f32 %v2310_v34, %v4045_v44  ;;  %v1973_v18 = vpop.f32.mrb[65].mxu1  ;;  %v2312_v22 = vpop.f32.mrb[65].mxu0 }
 0x29c   :  { %v3072_v36 = vadd.f32 %v1973_v18, %v4049_v20  ;;  %v3104_v29 = vadd.f32 %v2312_v22, %v4053_v21  ;;  %v1975_v33 = vpop.f32.mrb[66].mxu1  ;;  %v2314_v19 = vpop.f32.mrb[66].mxu0 }
 0x29d   :  { %v2436_v23 = vmax.f32 %v2404_v11, %v2420_v16  ;;  %v2377_v26 = vmax.f32 %v3071_v17, 0.0  ;;  %v2379_v28 = vmax.f32 %v3103_v14, 0.0  ;;  %v3073_v52 = vadd.f32 %v1975_v33, %v4041_v37  ;;  %v1977_v30 = vpop.f32.mrb[67].mxu1  ;;  %v2316_v39 = vpop.f32.mrb[67].mxu0 }
 0x29e   :  { %v2378_v40 = vmax.f32 %v3072_v36, 0.0  ;;  %v2380_v42 = vmax.f32 %v3104_v29, 0.0  ;;  %v3105_v46 = vadd.f32 %v2314_v19, %v4045_v44  ;;  %v3074_v7 = vadd.f32 %v1977_v30, %v4049_v20 }
 0x29f   :  { %v2381_v48 = vmax.f32 %v3073_v52, 0.0  ;;  %v3106_v38 = vadd.f32 %v2316_v39, %v4053_v21  ;;  %v2446_v50 = vpack.c.bf16 %v2436_v23, %v2435_v27  ;;  %v3589_v14 = vmov 0.0  }
 0x2a0   :  { %v2405_v51 = vmax.f32 %v2377_v26, %v2378_v40  ;;  %v2421_v53 = vmax.f32 %v2379_v28, %v2380_v42  ;;  %v2383_v55 = vmax.f32 %v3105_v46, 0.0  ;;  %v2382_v56 = vmax.f32 %v3074_v7, 0.0  ;;  %3019 = vmatprep.subr.bf16.mxu0 %v3589_v14  ;;  %3035 = vmatprep.mubr.msk.bf16.mxu0 %vm3590_vm1, %v3589_v14 }
 0x2a1   :  { %v2384_v57 = vmax.f32 %v3106_v38, 0.0  ;;  %3012 = vmatmul.mubr.bf16.gmra.mrb[80].mxu1 %v2446_v50 }
 0x2a2   :  { %v2437_v35 = vmax.f32 %v2405_v51, %v2421_v53  ;;  %v2406_v58 = vmax.f32 %v2381_v48, %v2382_v56  ;;  %v1981_v59 = vpop.f32.mrb[68].mxu1  ;;  %v2320_v41 = vpop.f32.mrb[68].mxu0 }
 0x2a3   :  { %v2422_v24 = vmax.f32 %v2383_v55, %v2384_v57  ;;  %v3075_v61 = vadd.f32 %v1981_v59, %v4041_v37  ;;  %v3107_v62 = vadd.f32 %v2320_v41, %v4045_v44  ;;  %v1983_v63 = vpop.f32.mrb[69].mxu1  ;;  %v2322_v1 = vpop.f32.mrb[69].mxu0 }
 0x2a4   :  { %v3076_v47 = vadd.f32 %v1983_v63, %v4049_v20  ;;  %v3108_v4 = vadd.f32 %v2322_v1, %v4053_v21  ;;  %v1985_v45 = vpop.f32.mrb[70].mxu1  ;;  %v2324_v5 = vpop.f32.mrb[70].mxu0 }
 0x2a5   :  { %v2438_v43 = vmax.f32 %v2406_v58, %v2422_v24  ;;  %v2385_v6 = vmax.f32 %v3075_v61, 0.0  ;;  %v2387_v15 = vmax.f32 %v3107_v62, 0.0  ;;  %v3077_v8 = vadd.f32 %v1985_v45, %v4041_v37  ;;  %v1987_v10 = vpop.f32.mrb[71].mxu1  ;;  %v2326_v12 = vpop.f32.mrb[71].mxu0 }
 0x2a6   :  { %v2386_v13 = vmax.f32 %v3076_v47, 0.0  ;;  %v2388_v9 = vmax.f32 %v3108_v4, 0.0  ;;  %v3109_v60 = vadd.f32 %v2324_v5, %v4045_v44  ;;  %v3078_v3 = vadd.f32 %v1987_v10, %v4049_v20  ;;  %v2642_v44 = vld [vmem:[%s4157_s8] sm:$0x3] }
 0x2a7   :  { %v2389_v49 = vmax.f32 %v3077_v8, 0.0  ;;  %v3110_v54 = vadd.f32 %v2326_v12, %v4053_v21  ;;  %v2447_v31 = vpack.c.bf16 %v2438_v43, %v2437_v35  ;;  %2645 = vperm.xlu0 %3249, %v2642_v44   ;;  %v2917_v20 = vld [vmem:[%s4155_s6] ss:$0 sm:$0xff] }
 0x2a8   :  { %v2407_v32 = vmax.f32 %v2385_v6, %v2386_v13  ;;  %v2423_v0 = vmax.f32 %v2387_v15, %v2388_v9  ;;  %v2391_v25 = vmax.f32 %v3109_v60, 0.0  ;;  %v2390_v27 = vmax.f32 %v3078_v3, 0.0 }
 0x2a9   :  { %v2392_v11 = vmax.f32 %v3110_v54, 0.0  ;;  %3015 = vmatprep.mubr.bf16.mxu1 %v2447_v31 }
 0x2aa   :  { %v2439_v2 = vmax.f32 %v2407_v32, %v2423_v0  ;;  %v2408_v37 = vmax.f32 %v2389_v49, %v2390_v27 }
 0x2ab   :  { %v2424_v34 = vmax.f32 %v2391_v25, %v2392_v11 }
 0x2ad   :  { %v2440_v16 = vmax.f32 %v2408_v37, %v2424_v34 }
 0x2af   :  { %v2448_v17 = vpack.c.bf16 %v2440_v16, %v2439_v2  ;;  %v2641_v2 = vld [vmem:[%s4156_s7] sm:$0x1] }
 0x2b1   :  { %3016 = vmatmul.mubr.bf16.gmra.mrb[84].mxu1 %v2448_v17 }
 0x326   :  { %v2646_v37 = vpop.permute.xlu0 %2645 }
 0x353   :  { %v3005_v21 = vpop.f32.mrb[72].mxu1 }
 0x354   :  { %v2563_v18 = vadd.f32 %v3005_v21, %v2917_v20  ;;  %v2554_v22 = vpop.f32.mrb[73].mxu1 }
 0x355   :  { %v2555_v36 = vadd.f32 %v2917_v20, %v2554_v22  ;;  %v3006_v29 = vpop.f32.mrb[74].mxu1 }
 0x356   :  { %v2566_v33 = vadd.f32 %v3006_v29, %v2917_v20  ;;  %v2557_v19 = vpop.f32.mrb[75].mxu1  ;;  %v2619_v26 = vmax.f32 %v2563_v18, 0.0 }
 0x357   :  { %v2558_v23 = vadd.f32 %v2917_v20, %v2557_v19  ;;  %v2617_v52 = vmax.f32 %v2555_v36, 0.0 }
 0x358   :  { %v2620_v28 = vmax.f32 %v2566_v33, 0.0 }
 0x359   :  { %v2618_v30 = vmax.f32 %v2558_v23, 0.0 }
 0x35a   :  { %v2634_v39 = vpack.c.bf16 %v2620_v28, %v2619_v26 }
 0x35b   :  { %v2633_v40 = vpack.c.bf16 %v2618_v30, %v2617_v52 }
 0x35d   :  { %3020 = vmatpush3.bf16.xpose.msra.mxu0 %v2633_v40 }
 0x35e   :  { %3021 = vmatprep.subr.bf16.mxu0 %v3589_v14 }
 0x364   :  { %v3009_v42 = vpop.f32.mrb[76].mxu1 }
 0x365   :  { %v2579_v46 = vadd.f32 %v3009_v42, %v2917_v20  ;;  %v2570_v7 = vpop.f32.mrb[77].mxu1  ;;  %3022 = vmatpush3.bf16.xpose.msra.mxu0 %v2634_v39 }
 0x366   :  { %v2571_v48 = vadd.f32 %v2917_v20, %v2570_v7  ;;  %v3010_v38 = vpop.f32.mrb[78].mxu1  ;;  %3023 = vmatprep.subr.bf16.mxu0 %v3589_v14 }
 0x367   :  { %v2582_v50 = vadd.f32 %v3010_v38, %v2917_v20  ;;  %v2573_v51 = vpop.f32.mrb[79].mxu1  ;;  %v2623_v55 = vmax.f32 %v2579_v46, 0.0 }
 0x368   :  { %v2574_v53 = vadd.f32 %v2917_v20, %v2573_v51  ;;  %v2621_v57 = vmax.f32 %v2571_v48, 0.0 }
 0x369   :  { %v2624_v56 = vmax.f32 %v2582_v50, 0.0 }
 0x36a   :  { %v2622_v35 = vmax.f32 %v2574_v53, 0.0 }
 0x36b   :  { %v2636_v58 = vpack.c.bf16 %v2624_v56, %v2623_v55 }
 0x36c   :  { %v2635_v59 = vpack.c.bf16 %v2622_v35, %v2621_v57 }
 0x36e   :  { %3024 = vmatpush3.bf16.xpose.msra.mxu0 %v2635_v59 }
 0x36f   :  { %3025 = vmatprep.subr.bf16.mxu0 %v3589_v14 }
 0x374   :  { %v3013_v41 = vpop.f32.mrb[80].mxu1 }
 0x375   :  { %v2595_v24 = vadd.f32 %v3013_v41, %v2917_v20  ;;  %v2586_v61 = vpop.f32.mrb[81].mxu1 }
 0x376   :  { %v2587_v62 = vadd.f32 %v2917_v20, %v2586_v61  ;;  %v3014_v63 = vpop.f32.mrb[82].mxu1  ;;  %3026 = vmatpush3.bf16.xpose.msra.mxu0 %v2636_v58 }
 0x377   :  { %v2598_v1 = vadd.f32 %v3014_v63, %v2917_v20  ;;  %v2589_v47 = vpop.f32.mrb[83].mxu1  ;;  %3027 = vmatprep.subr.bf16.mxu0 %v3589_v14  ;;  %v2627_v45 = vmax.f32 %v2595_v24, 0.0 }
 0x378   :  { %v2590_v4 = vadd.f32 %v2917_v20, %v2589_v47  ;;  %v2625_v43 = vmax.f32 %v2587_v62, 0.0 }
 0x379   :  { %v2628_v5 = vmax.f32 %v2598_v1, 0.0 }
 0x37a   :  { %v2626_v6 = vmax.f32 %v2590_v4, 0.0 }
 0x37b   :  { %v2638_v15 = vpack.c.bf16 %v2628_v5, %v2627_v45 }
 0x37c   :  { %v2637_v8 = vpack.c.bf16 %v2626_v6, %v2625_v43 }
 0x37e   :  { %3028 = vmatpush3.bf16.xpose.msra.mxu0 %v2637_v8 }
 0x37f   :  { %3029 = vmatprep.subr.bf16.mxu0 %v3589_v14 }
 0x384   :  { %v3017_v10 = vpop.f32.mrb[84].mxu1 }
 0x385   :  { %v2611_v12 = vadd.f32 %v3017_v10, %v2917_v20  ;;  %v2602_v13 = vpop.f32.mrb[85].mxu1 }
 0x386   :  { %v2603_v9 = vadd.f32 %v2917_v20, %v2602_v13  ;;  %v3018_v60 = vpop.f32.mrb[86].mxu1  ;;  %3030 = vmatpush3.bf16.xpose.msra.mxu0 %v2638_v15 }
 0x387   :  { %v2614_v3 = vadd.f32 %v3018_v60, %v2917_v20  ;;  %v2605_v49 = vpop.f32.mrb[87].mxu1  ;;  %3031 = vmatprep.subr.bf16.mxu0 %v3589_v14  ;;  %v2631_v31 = vmax.f32 %v2611_v12, 0.0 }
 0x388   :  { %v2606_v54 = vadd.f32 %v2917_v20, %v2605_v49  ;;  %v2629_v0 = vmax.f32 %v2603_v9, 0.0 }
 0x389   :  { %v2632_v32 = vmax.f32 %v2614_v3, 0.0 }
 0x38a   :  { %v2630_v25 = vmax.f32 %v2606_v54, 0.0 }
 0x38b   :  { %v2640_v27 = vpack.c.bf16 %v2632_v32, %v2631_v31 }
 0x38c   :  { %v2639_v11 = vpack.c.bf16 %v2630_v25, %v2629_v0 }
 0x38e   :  { %3032 = vmatpush3.bf16.xpose.msra.mxu0 %v2639_v11 }
 0x38f   :  { %3033 = vmatprep.subr.bf16.mxu0 %v3589_v14 }
 0x396   :  { %3034 = vmatpush3.bf16.xpose.msra.mxu0 %v2640_v27 }
 0x39d   :  { %3036 = vmatmul.mubr.bf16.vlgmr.msra.gmra.mrb[72].mxu0 %v2641_v2 }
 0x470   :  { %v2682_v34 = vpop.f32.mrb[72].mxu0 }
 0x471   :  { %v2683_v16 = vadd.f32 %v2682_v34, %v2646_v37  ;;  %v3037_v17 = vpop.f32.mrb[73].mxu0 }
 0x472   :  { %v2685_v44 = vpop.f32.mrb[74].mxu0 }
 0x473   :  { %2688 = vst [vmem:[#allocation7] sm:$0x3] %v2683_v16  ;;  %v3038_v20 = vpop.f32.mrb[75].mxu0 }
 0x474   :  { %3565 = shalt.err (!%p3562_p6)
}
 0x475   :  { %s3566_s30 = scalar_lea.hbm %s4158_s9, 32 }
 0x476   :  { %p3567_p7 = scmp.ne.s32.totalorder %s4158_s9, %s3566_s30  ;;  %p3570_p8 = scmp.lt.u32.totalorder %s3566_s30, %s4158_s9 }
 0x478   :  { %p3572_p9 = pnand %p3570_p8, %p3567_p7 }
 0x47a   :  { %3575 = shalt.err (!%p3572_p9)
}
 0x47b   :  { %2698 = dma.vmem_to_hbm [thread:$0]  %s2696_s28, 32, %s4158_s9, [#allocation4]  }
 0x47c   :  { %3580 = dma.done.wait [#allocation4], 32  }
 0x47d   :  { %3581 = vsyncadd [#allocation4], 4294967264 }
 0x47e   :  { %2702 = vsyncpa [#allocation3], 1 }
 0x47f   :  { %2703 = vsyncpa [#allocation6], 1 }
 0x480   :  { %2704 = vsyncpa [#allocation4], 1 }

</bundles_post_ra>
